<compile_context>
chip_gen: v7x
topology: tpu7x:2x2x1
jax: 0.10.0
libtpu: 0.0.40
codegen_flags: <defaults>
</compile_context>

<pallas_src>
from functools import partial

import jax
import jax.numpy as jnp
from jax.experimental import pallas as pl
from jax.experimental.pallas import tpu as pltpu

# -------------------- model hyper-parameters (small, synthetic) --------------------
VOCAB = 32
EMBED = 16
HIDDEN = 32
NUM_LAYERS = 2   # kernel below is written explicitly for 2 GRU layers
BATCH = 4
SEQ = 8


# ----------------------------------- kernel ---------------------------------------
def decoder_kernel(xs_ref, h_init_ref, w_ih0x_ref, w_ih0c_ref, b0_ref,
                   w_hh0_ref, bh0n_ref, w_ih1p_ref, w_hh1p_ref, b1_ref,
                   w_out_ref, b_out_ref,
                   out_ref, state_ref,
                   gi0_ref, h_all_ref):
    """Whole decoder forward in one invocation (written for NUM_LAYERS == 2).

    xs_ref     : (S*Bp, E)   time-major flattened, batch-padded embeddings
    h_init_ref : (L, Bp, H)  initial hidden state (L == 2); layer L-1 is the context
    w_ih0x_ref : (E, 3H)     layer-0 input weight, x part, gate order [r|z|n]
    w_ih0c_ref : (H, 3H)     layer-0 input weight, context part
    b0_ref     : (1, 3H)     b_ih0 (all gates) + b_hh0 (r,z gates) pre-summed
    w_hh0_ref  : (H, 3H)     layer-0 recurrent weight, packed [r|z|n]
    bh0n_ref   : (1, 3H)     [0 | 0 | b_hh0_n]  (added to the recurrent matmul result)
    w_ih1p_ref : (H, 4H)     [W_ih1_r | W_ih1_z | W_ih1_n | 0]
    w_hh1p_ref : (H, 4H)     [W_hh1_r | W_hh1_z | 0 | W_hh1_n]
    b1_ref     : (1, 4H)     [b_r_sum | b_z_sum | b_ih1_n | b_hh1_n]
    w_out_ref  : (H, Vp)     vocab projection (V padded to 128 lanes)
    b_out_ref  : (1, Vp)
    out_ref    : (S*Bp, Vp)  logits, time-major flattened
    state_ref  : (L, Bp, H)  final hidden state
    gi0_ref    : (S*Bp, 3H)  VMEM scratch: layer-0 input gates, lane-packed
    h_all_ref  : (S*Bp, H)   VMEM scratch: layer-1 hidden per step
    """
    L, BP, H = h_init_ref.shape
    S = xs_ref.shape[0] // BP
    H2, H3, H4 = 2 * H, 3 * H, 4 * H

    def mm(a, b):
        return jnp.dot(a, b, preferred_element_type=jnp.float32)

    # ---- time-invariant work, hoisted out of the recurrence ----
    # layer-0 input gates for every step: ONE lane-packed (S*BP, E)@(E, 3H) matmul
    gi0_ref[...] = mm(xs_ref[...], w_ih0x_ref[...])
    # constant encoder-context contribution + folded biases (computed once, not S times)
    gi_const = mm(h_init_ref[L - 1], w_ih0c_ref[...]) + b0_ref[...]        # (BP, 3H)

    # loop-invariant operands: load / broadcast exactly once
    w_hh0 = w_hh0_ref[...]
    w_ih1p = w_ih1p_ref[...]
    w_hh1p = w_hh1p_ref[...]
    bh0n = jnp.broadcast_to(bh0n_ref[...], (BP, H3))
    b1 = jnp.broadcast_to(b1_ref[...], (BP, H4))

    def step(t, carry):
        h0, h1 = carry
        row = pl.multiple_of(t * BP, BP)                 # sublane-aligned time slice
        gi_t = gi0_ref[pl.ds(row, BP), :] + gi_const     # (BP, 3H), one packed load/add

        # ---- layer 0: ONE packed (BP,H)@(H,3H) matmul for all three gates ----
        gh0 = mm(h0, w_hh0) + bh0n                       # n lanes carry b_hh0_n
        s0 = gi_t + gh0
        rz0 = jax.nn.sigmoid(s0[:, :H2])
        r0 = rz0[:, :H]
        z0 = rz0[:, H:H2]
        n0 = jnp.tanh(gi_t[:, H2:H3] + r0 * gh0[:, H2:H3])
        h0n = (1.0 - z0) * n0 + z0 * h0

        # ---- layer 1: two packed (BP,H)@(H,4H) matmuls, single summed expression ----
        s1 = mm(h0n, w_ih1p) + mm(h1, w_hh1p) + b1       # (BP, 4H)
        rz1 = jax.nn.sigmoid(s1[:, :H2])
        r1 = rz1[:, :H]
        z1 = rz1[:, H:H2]
        n1 = jnp.tanh(s1[:, H2:H3] + r1 * s1[:, H3:H4])
        h1n = (1.0 - z1) * n1 + z1 * h1

        h_all_ref[pl.ds(row, BP), :] = h1n
        return (h0n, h1n)

    h0_f, h1_f = jax.lax.fori_loop(0, S, step,
                                   (h_init_ref[0], h_init_ref[1]),
                                   unroll=True)
    state_ref[0] = h0_f
    state_ref[1] = h1_f

    # ---- single batched, lane-dense vocab projection over all time steps ----
    out_ref[...] = mm(h_all_ref[...], w_out_ref[...]) + b_out_ref[...]


# ------------------------- one-time parameter repacking ----------------------------
def prepare_params(params):
    """Pure-parameter repacking, hoisted out of the per-call path (call once)."""
    f32 = jnp.float32
    H = params["w_hh0"].shape[0]
    E = params["embedding"].shape[1]
    V = params["w_out"].shape[1]
    VP = ((V + 127) // 128) * 128
    H2, H3 = 2 * H, 3 * H

    w_ih0 = params["w_ih0"].astype(f32)                              # (E+H, 3H)

    # fold b_ih0 (all gates) + b_hh0 (r,z only) into the layer-0 input-side bias
    b0_fold = params["b_ih0"] + jnp.concatenate(
        [params["b_hh0"][:, :H2], jnp.zeros((1, H), f32)], axis=1)   # (1, 3H)
    bh0n = jnp.concatenate(
        [jnp.zeros((1, H2), f32), params["b_hh0"][:, H2:H3]], axis=1)  # (1, 3H)

    zeros_hh = jnp.zeros((H, H), f32)
    w_ih1p = jnp.concatenate([params["w_ih1"], zeros_hh], axis=1)    # (H, 4H)
    w_hh1p = jnp.concatenate([params["w_hh1"][:, :H2], zeros_hh,
                              params["w_hh1"][:, H2:H3]], axis=1)    # (H, 4H)
    b1p = jnp.concatenate([params["b_ih1"][:, :H2] + params["b_hh1"][:, :H2],
                           params["b_ih1"][:, H2:H3],
                           params["b_hh1"][:, H2:H3]], axis=1)       # (1, 4H)

    w_out_p = jnp.zeros((H, VP), f32).at[:, :V].set(params["w_out"])
    b_out_p = jnp.zeros((1, VP), f32).at[:, :V].set(params["b_out"])

    return {
        "embedding": params["embedding"].astype(f32),
        "w_ih0_x": w_ih0[:E, :],            # (E, 3H)
        "w_ih0_c": w_ih0[E:, :],            # (H, 3H)
        "b0_fold": b0_fold,
        "w_hh0": params["w_hh0"].astype(f32),
        "bh0n": bh0n,
        "w_ih1p": w_ih1p,
        "w_hh1p": w_hh1p,
        "b1p": b1p,
        "w_out_p": w_out_p,
        "b_out_p": b_out_p,
    }


# ----------------------------------- wrapper ---------------------------------------
@partial(jax.jit, static_argnames=("vocab_size",))
def decoder_forward(X_tokens, state, prep, *, vocab_size):
    """Equivalent of Decoder.forward(X, state). Returns (output (B,S,V), state (L,B,H))."""
    B, S = X_tokens.shape
    L, _, H = state.shape
    E = prep["w_ih0_x"].shape[0]
    VP = prep["w_out_p"].shape[1]
    BP = ((B + 7) // 8) * 8        # pad batch to f32 sublane quantum
    f32 = jnp.float32

    # ---- minimal per-call glue: embedding gather + batch padding ----
    emb = jnp.take(prep["embedding"], X_tokens, axis=0)              # (B, S, E)
    xs = jnp.transpose(emb, (1, 0, 2))                               # (S, B, E)
    xs_p = jnp.zeros((S, BP, E), f32).at[:, :B, :].set(xs).reshape(S * BP, E)
    h_init_p = jnp.zeros((L, BP, H), f32).at[:, :B, :].set(state)

    out_flat, state_p = pl.pallas_call(
        decoder_kernel,
        out_shape=(
            jax.ShapeDtypeStruct((S * BP, VP), f32),                 # logits (padded)
            jax.ShapeDtypeStruct((L, BP, H), f32),                   # final state (padded)
        ),
        scratch_shapes=[
            pltpu.VMEM((S * BP, 3 * H), f32),                        # gi0 (lane-packed)
            pltpu.VMEM((S * BP, H), f32),                            # per-step layer-1 h
        ],
    )(xs_p, h_init_p, prep["w_ih0_x"], prep["w_ih0_c"], prep["b0_fold"],
      prep["w_hh0"], prep["bh0n"], prep["w_ih1p"], prep["w_hh1p"],
      prep["b1p"], prep["w_out_p"], prep["b_out_p"])

    out = out_flat.reshape(S, BP, VP)[:, :B, :vocab_size]            # (S, B, V)
    output = jnp.transpose(out, (1, 0, 2))                           # (B, S, V)
    return output, state_p[:, :B, :]


# ------------------------------ pure-JAX reference ----------------------------------
def decoder_reference(X_tokens, state, params):
    B, S = X_tokens.shape
    L, _, H = state.shape
    emb = jnp.take(params["embedding"], X_tokens, axis=0)
    xs = jnp.transpose(emb, (1, 0, 2))
    context = jnp.broadcast_to(state[-1], (S, B, H))
    xc = jnp.concatenate([xs, context], axis=2)

    def gru_cell(x, h_prev, w_ih, w_hh, b_ih, b_hh):
        gi = x @ w_ih + b_ih
        gh = h_prev @ w_hh + b_hh
        r = jax.nn.sigmoid(gi[:, 0:H] + gh[:, 0:H])
        z = jax.nn.sigmoid(gi[:, H:2 * H] + gh[:, H:2 * H])
        n = jnp.tanh(gi[:, 2 * H:3 * H] + r * gh[:, 2 * H:3 * H])
        return (1.0 - z) * n + z * h_prev

    layer_params = [
        (params["w_ih0"], params["w_hh0"], params["b_ih0"], params["b_hh0"]),
        (params["w_ih1"], params["w_hh1"], params["b_ih1"], params["b_hh1"]),
    ]

    h = [state[l] for l in range(L)]
    outs = []
    for t in range(S):
        inp = xc[t]
        for l in range(L):
            w_ih, w_hh, b_ih, b_hh = layer_params[l]
            h[l] = gru_cell(inp, h[l], w_ih, w_hh, b_ih, b_hh)
            inp = h[l]
        outs.append(h[-1] @ params["w_out"] + params["b_out"])
    out = jnp.stack(outs, axis=0)                                    # (S, B, V)
    return jnp.transpose(out, (1, 0, 2)), jnp.stack(h, axis=0)


# ------------------------------------ main ------------------------------------------
if __name__ == "__main__":
    key = jax.random.PRNGKey(0)
    keys = jax.random.split(key, 16)

    def unif(k, shape, scale=0.1):
        return jax.random.uniform(k, shape, jnp.float32, -scale, scale)

    EH = EMBED + HIDDEN
    params = {
        "embedding": unif(keys[0], (VOCAB, EMBED)),
        # GRU layer 0 (input size = EMBED + HIDDEN), gate order [r|z|n], (in, 3H)
        "w_ih0": unif(keys[1], (EH, 3 * HIDDEN)),
        "w_hh0": unif(keys[2], (HIDDEN, 3 * HIDDEN)),
        "b_ih0": unif(keys[3], (1, 3 * HIDDEN)),
        "b_hh0": unif(keys[4], (1, 3 * HIDDEN)),
        # GRU layer 1 (input size = HIDDEN)
        "w_ih1": unif(keys[5], (HIDDEN, 3 * HIDDEN)),
        "w_hh1": unif(keys[6], (HIDDEN, 3 * HIDDEN)),
        "b_ih1": unif(keys[7], (1, 3 * HIDDEN)),
        "b_hh1": unif(keys[8], (1, 3 * HIDDEN)),
        # dense
        "w_out": unif(keys[9], (HIDDEN, VOCAB)),
        "b_out": unif(keys[10], (1, VOCAB)),
    }

    X_tokens = jax.random.randint(keys[11], (BATCH, SEQ), 0, VOCAB, jnp.int32)
    init_state = unif(keys[12], (NUM_LAYERS, BATCH, HIDDEN), scale=0.5)

    prep = prepare_params(params)                    # one-time repacking (off hot path)

    out, new_state = decoder_forward(X_tokens, init_state, prep, vocab_size=VOCAB)
    out = jax.block_until_ready(out)
    new_state = jax.block_until_ready(new_state)

    out_ref, state_ref = decoder_reference(X_tokens, init_state, params)

    assert out.shape == (BATCH, SEQ, VOCAB), out.shape
    assert new_state.shape == (NUM_LAYERS, BATCH, HIDDEN), new_state.shape
    assert jnp.allclose(out, out_ref, atol=1e-5, rtol=1e-5), "output mismatch"
    assert jnp.allclose(new_state, state_ref, atol=1e-5, rtol=1e-5), "state mismatch"

    print("KERNEL_OK")
</pallas_src>

<mosaic_0001>
module attributes {stable_mosaic.version = 11 : i64} {
  func.func @decoder_kernel(%arg0: memref<64x16xf32, #tpu.memory_space<vmem>>, %arg1: memref<2x8x32xf32, #tpu.memory_space<vmem>>, %arg2: memref<16x96xf32, #tpu.memory_space<vmem>>, %arg3: memref<32x96xf32, #tpu.memory_space<vmem>>, %arg4: memref<1x96xf32, #tpu.memory_space<vmem>>, %arg5: memref<32x96xf32, #tpu.memory_space<vmem>>, %arg6: memref<1x96xf32, #tpu.memory_space<vmem>>, %arg7: memref<32x128xf32, #tpu.memory_space<vmem>>, %arg8: memref<32x128xf32, #tpu.memory_space<vmem>>, %arg9: memref<1x128xf32, #tpu.memory_space<vmem>>, %arg10: memref<32x128xf32, #tpu.memory_space<vmem>>, %arg11: memref<1x128xf32, #tpu.memory_space<vmem>>, %arg12: memref<64x128xf32, #tpu.memory_space<vmem>>, %arg13: memref<2x8x32xf32, #tpu.memory_space<vmem>>, %arg14: memref<64x96xf32, #tpu.memory_space<vmem>>, %arg15: memref<64x32xf32, #tpu.memory_space<vmem>>) attributes {dimension_semantics = [], scalar_prefetch = 0 : i64, scratch_operands = 2 : i64, tpu.core_type = #tpu.core_type<tc>} {
    %c0 = arith.constant 0 : index
    %c0_0 = arith.constant 0 : index
    %0 = vector.load %arg0[%c0, %c0_0] : memref<64x16xf32, #tpu.memory_space<vmem>>, vector<64x16xf32>
    %c0_1 = arith.constant 0 : index
    %c0_2 = arith.constant 0 : index
    %1 = vector.load %arg2[%c0_1, %c0_2] : memref<16x96xf32, #tpu.memory_space<vmem>>, vector<16x96xf32>
    %cst = arith.constant dense<0.000000e+00> : vector<64x96xf32>
    %2 = tpu.matmul %0, %1, %cst {dimension_numbers = #tpu.dot_dimension_numbers<[1], [0], [0], [1], [0, 0, 1, 1], [], []>} : vector<64x16xf32>, vector<16x96xf32>, vector<64x96xf32> -> vector<64x96xf32>
    %c0_3 = arith.constant 0 : index
    %c0_4 = arith.constant 0 : index
    %3 = vector.load %arg14[%c0_3, %c0_4] : memref<64x96xf32, #tpu.memory_space<vmem>>, vector<64x96xf32>
    tpu.vector_store %arg14[%c0_3, %c0_4], %2 {strides = array<i32>} : memref<64x96xf32, #tpu.memory_space<vmem>>, vector<64x96xf32>,
    %c1 = arith.constant 1 : index
    %c0_5 = arith.constant 0 : index
    %c0_6 = arith.constant 0 : index
    %4 = vector.load %arg1[%c1, %c0_5, %c0_6] : memref<2x8x32xf32, #tpu.memory_space<vmem>>, vector<1x8x32xf32>
    %5 = vector.shape_cast %4 : vector<1x8x32xf32> to vector<8x32xf32>
    %c0_7 = arith.constant 0 : index
    %c0_8 = arith.constant 0 : index
    %6 = vector.load %arg3[%c0_7, %c0_8] : memref<32x96xf32, #tpu.memory_space<vmem>>, vector<32x96xf32>
    %cst_9 = arith.constant dense<0.000000e+00> : vector<8x96xf32>
    %7 = tpu.matmul %5, %6, %cst_9 {dimension_numbers = #tpu.dot_dimension_numbers<[1], [0], [0], [1], [0, 0, 1, 1], [], []>} : vector<8x32xf32>, vector<32x96xf32>, vector<8x96xf32> -> vector<8x96xf32>
    %c0_10 = arith.constant 0 : index
    %c0_11 = arith.constant 0 : index
    %8 = vector.load %arg4[%c0_10, %c0_11] : memref<1x96xf32, #tpu.memory_space<vmem>>, vector<1x96xf32>
    %9 = vector.broadcast %8 : vector<1x96xf32> to vector<8x96xf32>
    %10 = arith.addf %7, %9 : vector<8x96xf32>
    %c0_12 = arith.constant 0 : index
    %c0_13 = arith.constant 0 : index
    %11 = vector.load %arg5[%c0_12, %c0_13] : memref<32x96xf32, #tpu.memory_space<vmem>>, vector<32x96xf32>
    %c0_14 = arith.constant 0 : index
    %c0_15 = arith.constant 0 : index
    %12 = vector.load %arg7[%c0_14, %c0_15] : memref<32x128xf32, #tpu.memory_space<vmem>>, vector<32x128xf32>
    %c0_16 = arith.constant 0 : index
    %c0_17 = arith.constant 0 : index
    %13 = vector.load %arg8[%c0_16, %c0_17] : memref<32x128xf32, #tpu.memory_space<vmem>>, vector<32x128xf32>
    %c0_18 = arith.constant 0 : index
    %c0_19 = arith.constant 0 : index
    %14 = vector.load %arg6[%c0_18, %c0_19] : memref<1x96xf32, #tpu.memory_space<vmem>>, vector<1x96xf32>
    %15 = vector.shape_cast %14 : vector<1x96xf32> to vector<1x96xf32>
    %16 = vector.broadcast %15 : vector<1x96xf32> to vector<8x96xf32>
    %c0_20 = arith.constant 0 : index
    %c0_21 = arith.constant 0 : index
    %17 = vector.load %arg9[%c0_20, %c0_21] : memref<1x128xf32, #tpu.memory_space<vmem>>, vector<1x128xf32>
    %18 = vector.shape_cast %17 : vector<1x128xf32> to vector<1x128xf32>
    %19 = vector.broadcast %18 : vector<1x128xf32> to vector<8x128xf32>
    %c0_22 = arith.constant 0 : index
    %c0_23 = arith.constant 0 : index
    %c0_24 = arith.constant 0 : index
    %20 = vector.load %arg1[%c0_22, %c0_23, %c0_24] : memref<2x8x32xf32, #tpu.memory_space<vmem>>, vector<1x8x32xf32>
    %21 = vector.shape_cast %20 : vector<1x8x32xf32> to vector<8x32xf32>
    %c1_25 = arith.constant 1 : index
    %c0_26 = arith.constant 0 : index
    %c0_27 = arith.constant 0 : index
    %22 = vector.load %arg1[%c1_25, %c0_26, %c0_27] : memref<2x8x32xf32, #tpu.memory_space<vmem>>, vector<1x8x32xf32>
    %23 = vector.shape_cast %22 : vector<1x8x32xf32> to vector<8x32xf32>
    %c0_i32 = arith.constant 0 : i32
    %c8_i32 = arith.constant 8 : i32
    %24 = arith.muli %c0_i32, %c8_i32 : i32
    %25 = tpu.assume_multiple %24, 8 : i32
    %26 = arith.index_cast %25 : i32 to index
    %c0_28 = arith.constant 0 : index
    %27 = vector.load %arg14[%26, %c0_28] : memref<64x96xf32, #tpu.memory_space<vmem>>, vector<8x96xf32>
    %28 = arith.addf %27, %10 : vector<8x96xf32>
    %cst_29 = arith.constant dense<0.000000e+00> : vector<8x96xf32>
    %29 = tpu.matmul %21, %11, %cst_29 {dimension_numbers = #tpu.dot_dimension_numbers<[1], [0], [0], [1], [0, 0, 1, 1], [], []>} : vector<8x32xf32>, vector<32x96xf32>, vector<8x96xf32> -> vector<8x96xf32>
    %30 = arith.addf %29, %16 : vector<8x96xf32>
    %31 = arith.addf %28, %30 : vector<8x96xf32>
    %32 = vector.extract_strided_slice %31 {offsets = [0, 0], sizes = [8, 64], strides = [1, 1]} : vector<8x96xf32> to vector<8x64xf32>
    %33 = arith.negf %32 : vector<8x64xf32>
    %34 = math.exp %33 : vector<8x64xf32>
    %cst_30 = arith.constant 1.000000e+00 : f32
    %35 = vector.broadcast %cst_30 : f32 to vector<8x64xf32>
    %36 = arith.addf %35, %34 : vector<8x64xf32>
    %37 = arith.divf %35, %36 : vector<8x64xf32>
    %38 = vector.extract_strided_slice %37 {offsets = [0, 0], sizes = [8, 32], strides = [1, 1]} : vector<8x64xf32> to vector<8x32xf32>
    %39 = vector.extract_strided_slice %37 {offsets = [0, 32], sizes = [8, 32], strides = [1, 1]} : vector<8x64xf32> to vector<8x32xf32>
    %40 = vector.extract_strided_slice %28 {offsets = [0, 64], sizes = [8, 32], strides = [1, 1]} : vector<8x96xf32> to vector<8x32xf32>
    %41 = vector.extract_strided_slice %30 {offsets = [0, 64], sizes = [8, 32], strides = [1, 1]} : vector<8x96xf32> to vector<8x32xf32>
    %42 = arith.mulf %38, %41 : vector<8x32xf32>
    %43 = arith.addf %40, %42 : vector<8x32xf32>
    %44 = math.tanh %43 : vector<8x32xf32>
    %cst_31 = arith.constant 1.000000e+00 : f32
    %45 = vector.broadcast %cst_31 : f32 to vector<8x32xf32>
    %46 = arith.subf %45, %39 : vector<8x32xf32>
    %47 = arith.mulf %46, %44 : vector<8x32xf32>
    %48 = arith.mulf %39, %21 : vector<8x32xf32>
    %49 = arith.addf %47, %48 : vector<8x32xf32>
    %cst_32 = arith.constant dense<0.000000e+00> : vector<8x128xf32>
    %50 = tpu.matmul %49, %12, %cst_32 {dimension_numbers = #tpu.dot_dimension_numbers<[1], [0], [0], [1], [0, 0, 1, 1], [], []>} : vector<8x32xf32>, vector<32x128xf32>, vector<8x128xf32> -> vector<8x128xf32>
    %cst_33 = arith.constant dense<0.000000e+00> : vector<8x128xf32>
    %51 = tpu.matmul %23, %13, %cst_33 {dimension_numbers = #tpu.dot_dimension_numbers<[1], [0], [0], [1], [0, 0, 1, 1], [], []>} : vector<8x32xf32>, vector<32x128xf32>, vector<8x128xf32> -> vector<8x128xf32>
    %52 = arith.addf %50, %51 : vector<8x128xf32>
    %53 = arith.addf %52, %19 : vector<8x128xf32>
    %54 = vector.extract_strided_slice %53 {offsets = [0, 0], sizes = [8, 64], strides = [1, 1]} : vector<8x128xf32> to vector<8x64xf32>
    %55 = arith.negf %54 : vector<8x64xf32>
    %56 = math.exp %55 : vector<8x64xf32>
    %cst_34 = arith.constant 1.000000e+00 : f32
    %57 = vector.broadcast %cst_34 : f32 to vector<8x64xf32>
    %58 = arith.addf %57, %56 : vector<8x64xf32>
    %59 = arith.divf %57, %58 : vector<8x64xf32>
    %60 = vector.extract_strided_slice %59 {offsets = [0, 0], sizes = [8, 32], strides = [1, 1]} : vector<8x64xf32> to vector<8x32xf32>
    %61 = vector.extract_strided_slice %59 {offsets = [0, 32], sizes = [8, 32], strides = [1, 1]} : vector<8x64xf32> to vector<8x32xf32>
    %62 = vector.extract_strided_slice %53 {offsets = [0, 64], sizes = [8, 32], strides = [1, 1]} : vector<8x128xf32> to vector<8x32xf32>
    %63 = vector.extract_strided_slice %53 {offsets = [0, 96], sizes = [8, 32], strides = [1, 1]} : vector<8x128xf32> to vector<8x32xf32>
    %64 = arith.mulf %60, %63 : vector<8x32xf32>
    %65 = arith.addf %62, %64 : vector<8x32xf32>
    %66 = math.tanh %65 : vector<8x32xf32>
    %cst_35 = arith.constant 1.000000e+00 : f32
    %67 = vector.broadcast %cst_35 : f32 to vector<8x32xf32>
    %68 = arith.subf %67, %61 : vector<8x32xf32>
    %69 = arith.mulf %68, %66 : vector<8x32xf32>
    %70 = arith.mulf %61, %23 : vector<8x32xf32>
    %71 = arith.addf %69, %70 : vector<8x32xf32>
    %72 = arith.index_cast %25 : i32 to index
    %c0_36 = arith.constant 0 : index
    %73 = vector.load %arg15[%72, %c0_36] : memref<64x32xf32, #tpu.memory_space<vmem>>, vector<8x32xf32>
    tpu.vector_store %arg15[%72, %c0_36], %71 {strides = array<i32>} : memref<64x32xf32, #tpu.memory_space<vmem>>, vector<8x32xf32>,
    %c1_i32 = arith.constant 1 : i32
    %c8_i32_37 = arith.constant 8 : i32
    %74 = arith.muli %c1_i32, %c8_i32_37 : i32
    %75 = tpu.assume_multiple %74, 8 : i32
    %76 = arith.index_cast %75 : i32 to index
    %c0_38 = arith.constant 0 : index
    %77 = vector.load %arg14[%76, %c0_38] : memref<64x96xf32, #tpu.memory_space<vmem>>, vector<8x96xf32>
    %78 = arith.addf %77, %10 : vector<8x96xf32>
    %cst_39 = arith.constant dense<0.000000e+00> : vector<8x96xf32>
    %79 = tpu.matmul %49, %11, %cst_39 {dimension_numbers = #tpu.dot_dimension_numbers<[1], [0], [0], [1], [0, 0, 1, 1], [], []>} : vector<8x32xf32>, vector<32x96xf32>, vector<8x96xf32> -> vector<8x96xf32>
    %80 = arith.addf %79, %16 : vector<8x96xf32>
    %81 = arith.addf %78, %80 : vector<8x96xf32>
    %82 = vector.extract_strided_slice %81 {offsets = [0, 0], sizes = [8, 64], strides = [1, 1]} : vector<8x96xf32> to vector<8x64xf32>
    %83 = arith.negf %82 : vector<8x64xf32>
    %84 = math.exp %83 : vector<8x64xf32>
    %cst_40 = arith.constant 1.000000e+00 : f32
    %85 = vector.broadcast %cst_40 : f32 to vector<8x64xf32>
    %86 = arith.addf %85, %84 : vector<8x64xf32>
    %87 = arith.divf %85, %86 : vector<8x64xf32>
    %88 = vector.extract_strided_slice %87 {offsets = [0, 0], sizes = [8, 32], strides = [1, 1]} : vector<8x64xf32> to vector<8x32xf32>
    %89 = vector.extract_strided_slice %87 {offsets = [0, 32], sizes = [8, 32], strides = [1, 1]} : vector<8x64xf32> to vector<8x32xf32>
    %90 = vector.extract_strided_slice %78 {offsets = [0, 64], sizes = [8, 32], strides = [1, 1]} : vector<8x96xf32> to vector<8x32xf32>
    %91 = vector.extract_strided_slice %80 {offsets = [0, 64], sizes = [8, 32], strides = [1, 1]} : vector<8x96xf32> to vector<8x32xf32>
    %92 = arith.mulf %88, %91 : vector<8x32xf32>
    %93 = arith.addf %90, %92 : vector<8x32xf32>
    %94 = math.tanh %93 : vector<8x32xf32>
    %cst_41 = arith.constant 1.000000e+00 : f32
    %95 = vector.broadcast %cst_41 : f32 to vector<8x32xf32>
    %96 = arith.subf %95, %89 : vector<8x32xf32>
    %97 = arith.mulf %96, %94 : vector<8x32xf32>
    %98 = arith.mulf %89, %49 : vector<8x32xf32>
    %99 = arith.addf %97, %98 : vector<8x32xf32>
    %cst_42 = arith.constant dense<0.000000e+00> : vector<8x128xf32>
    %100 = tpu.matmul %99, %12, %cst_42 {dimension_numbers = #tpu.dot_dimension_numbers<[1], [0], [0], [1], [0, 0, 1, 1], [], []>} : vector<8x32xf32>, vector<32x128xf32>, vector<8x128xf32> -> vector<8x128xf32>
    %cst_43 = arith.constant dense<0.000000e+00> : vector<8x128xf32>
    %101 = tpu.matmul %71, %13, %cst_43 {dimension_numbers = #tpu.dot_dimension_numbers<[1], [0], [0], [1], [0, 0, 1, 1], [], []>} : vector<8x32xf32>, vector<32x128xf32>, vector<8x128xf32> -> vector<8x128xf32>
    %102 = arith.addf %100, %101 : vector<8x128xf32>
    %103 = arith.addf %102, %19 : vector<8x128xf32>
    %104 = vector.extract_strided_slice %103 {offsets = [0, 0], sizes = [8, 64], strides = [1, 1]} : vector<8x128xf32> to vector<8x64xf32>
    %105 = arith.negf %104 : vector<8x64xf32>
    %106 = math.exp %105 : vector<8x64xf32>
    %cst_44 = arith.constant 1.000000e+00 : f32
    %107 = vector.broadcast %cst_44 : f32 to vector<8x64xf32>
    %108 = arith.addf %107, %106 : vector<8x64xf32>
    %109 = arith.divf %107, %108 : vector<8x64xf32>
    %110 = vector.extract_strided_slice %109 {offsets = [0, 0], sizes = [8, 32], strides = [1, 1]} : vector<8x64xf32> to vector<8x32xf32>
    %111 = vector.extract_strided_slice %109 {offsets = [0, 32], sizes = [8, 32], strides = [1, 1]} : vector<8x64xf32> to vector<8x32xf32>
    %112 = vector.extract_strided_slice %103 {offsets = [0, 64], sizes = [8, 32], strides = [1, 1]} : vector<8x128xf32> to vector<8x32xf32>
    %113 = vector.extract_strided_slice %103 {offsets = [0, 96], sizes = [8, 32], strides = [1, 1]} : vector<8x128xf32> to vector<8x32xf32>
    %114 = arith.mulf %110, %113 : vector<8x32xf32>
    %115 = arith.addf %112, %114 : vector<8x32xf32>
    %116 = math.tanh %115 : vector<8x32xf32>
    %cst_45 = arith.constant 1.000000e+00 : f32
    %117 = vector.broadcast %cst_45 : f32 to vector<8x32xf32>
    %118 = arith.subf %117, %111 : vector<8x32xf32>
    %119 = arith.mulf %118, %116 : vector<8x32xf32>
    %120 = arith.mulf %111, %71 : vector<8x32xf32>
    %121 = arith.addf %119, %120 : vector<8x32xf32>
    %122 = arith.index_cast %75 : i32 to index
    %c0_46 = arith.constant 0 : index
    %123 = vector.load %arg15[%122, %c0_46] : memref<64x32xf32, #tpu.memory_space<vmem>>, vector<8x32xf32>
    tpu.vector_store %arg15[%122, %c0_46], %121 {strides = array<i32>} : memref<64x32xf32, #tpu.memory_space<vmem>>, vector<8x32xf32>,
    %c2_i32 = arith.constant 2 : i32
    %c8_i32_47 = arith.constant 8 : i32
    %124 = arith.muli %c2_i32, %c8_i32_47 : i32
    %125 = tpu.assume_multiple %124, 8 : i32
    %126 = arith.index_cast %125 : i32 to index
    %c0_48 = arith.constant 0 : index
    %127 = vector.load %arg14[%126, %c0_48] : memref<64x96xf32, #tpu.memory_space<vmem>>, vector<8x96xf32>
    %128 = arith.addf %127, %10 : vector<8x96xf32>
    %cst_49 = arith.constant dense<0.000000e+00> : vector<8x96xf32>
    %129 = tpu.matmul %99, %11, %cst_49 {dimension_numbers = #tpu.dot_dimension_numbers<[1], [0], [0], [1], [0, 0, 1, 1], [], []>} : vector<8x32xf32>, vector<32x96xf32>, vector<8x96xf32> -> vector<8x96xf32>
    %130 = arith.addf %129, %16 : vector<8x96xf32>
    %131 = arith.addf %128, %130 : vector<8x96xf32>
    %132 = vector.extract_strided_slice %131 {offsets = [0, 0], sizes = [8, 64], strides = [1, 1]} : vector<8x96xf32> to vector<8x64xf32>
    %133 = arith.negf %132 : vector<8x64xf32>
    %134 = math.exp %133 : vector<8x64xf32>
    %cst_50 = arith.constant 1.000000e+00 : f32
    %135 = vector.broadcast %cst_50 : f32 to vector<8x64xf32>
    %136 = arith.addf %135, %134 : vector<8x64xf32>
    %137 = arith.divf %135, %136 : vector<8x64xf32>
    %138 = vector.extract_strided_slice %137 {offsets = [0, 0], sizes = [8, 32], strides = [1, 1]} : vector<8x64xf32> to vector<8x32xf32>
    %139 = vector.extract_strided_slice %137 {offsets = [0, 32], sizes = [8, 32], strides = [1, 1]} : vector<8x64xf32> to vector<8x32xf32>
    %140 = vector.extract_strided_slice %128 {offsets = [0, 64], sizes = [8, 32], strides = [1, 1]} : vector<8x96xf32> to vector<8x32xf32>
    %141 = vector.extract_strided_slice %130 {offsets = [0, 64], sizes = [8, 32], strides = [1, 1]} : vector<8x96xf32> to vector<8x32xf32>
    %142 = arith.mulf %138, %141 : vector<8x32xf32>
    %143 = arith.addf %140, %142 : vector<8x32xf32>
    %144 = math.tanh %143 : vector<8x32xf32>
    %cst_51 = arith.constant 1.000000e+00 : f32
    %145 = vector.broadcast %cst_51 : f32 to vector<8x32xf32>
    %146 = arith.subf %145, %139 : vector<8x32xf32>
    %147 = arith.mulf %146, %144 : vector<8x32xf32>
    %148 = arith.mulf %139, %99 : vector<8x32xf32>
    %149 = arith.addf %147, %148 : vector<8x32xf32>
    %cst_52 = arith.constant dense<0.000000e+00> : vector<8x128xf32>
    %150 = tpu.matmul %149, %12, %cst_52 {dimension_numbers = #tpu.dot_dimension_numbers<[1], [0], [0], [1], [0, 0, 1, 1], [], []>} : vector<8x32xf32>, vector<32x128xf32>, vector<8x128xf32> -> vector<8x128xf32>
    %cst_53 = arith.constant dense<0.000000e+00> : vector<8x128xf32>
    %151 = tpu.matmul %121, %13, %cst_53 {dimension_numbers = #tpu.dot_dimension_numbers<[1], [0], [0], [1], [0, 0, 1, 1], [], []>} : vector<8x32xf32>, vector<32x128xf32>, vector<8x128xf32> -> vector<8x128xf32>
    %152 = arith.addf %150, %151 : vector<8x128xf32>
    %153 = arith.addf %152, %19 : vector<8x128xf32>
    %154 = vector.extract_strided_slice %153 {offsets = [0, 0], sizes = [8, 64], strides = [1, 1]} : vector<8x128xf32> to vector<8x64xf32>
    %155 = arith.negf %154 : vector<8x64xf32>
    %156 = math.exp %155 : vector<8x64xf32>
    %cst_54 = arith.constant 1.000000e+00 : f32
    %157 = vector.broadcast %cst_54 : f32 to vector<8x64xf32>
    %158 = arith.addf %157, %156 : vector<8x64xf32>
    %159 = arith.divf %157, %158 : vector<8x64xf32>
    %160 = vector.extract_strided_slice %159 {offsets = [0, 0], sizes = [8, 32], strides = [1, 1]} : vector<8x64xf32> to vector<8x32xf32>
    %161 = vector.extract_strided_slice %159 {offsets = [0, 32], sizes = [8, 32], strides = [1, 1]} : vector<8x64xf32> to vector<8x32xf32>
    %162 = vector.extract_strided_slice %153 {offsets = [0, 64], sizes = [8, 32], strides = [1, 1]} : vector<8x128xf32> to vector<8x32xf32>
    %163 = vector.extract_strided_slice %153 {offsets = [0, 96], sizes = [8, 32], strides = [1, 1]} : vector<8x128xf32> to vector<8x32xf32>
    %164 = arith.mulf %160, %163 : vector<8x32xf32>
    %165 = arith.addf %162, %164 : vector<8x32xf32>
    %166 = math.tanh %165 : vector<8x32xf32>
    %cst_55 = arith.constant 1.000000e+00 : f32
    %167 = vector.broadcast %cst_55 : f32 to vector<8x32xf32>
    %168 = arith.subf %167, %161 : vector<8x32xf32>
    %169 = arith.mulf %168, %166 : vector<8x32xf32>
    %170 = arith.mulf %161, %121 : vector<8x32xf32>
    %171 = arith.addf %169, %170 : vector<8x32xf32>
    %172 = arith.index_cast %125 : i32 to index
    %c0_56 = arith.constant 0 : index
    %173 = vector.load %arg15[%172, %c0_56] : memref<64x32xf32, #tpu.memory_space<vmem>>, vector<8x32xf32>
    tpu.vector_store %arg15[%172, %c0_56], %171 {strides = array<i32>} : memref<64x32xf32, #tpu.memory_space<vmem>>, vector<8x32xf32>,
    %c3_i32 = arith.constant 3 : i32
    %c8_i32_57 = arith.constant 8 : i32
    %174 = arith.muli %c3_i32, %c8_i32_57 : i32
    %175 = tpu.assume_multiple %174, 8 : i32
    %176 = arith.index_cast %175 : i32 to index
    %c0_58 = arith.constant 0 : index
    %177 = vector.load %arg14[%176, %c0_58] : memref<64x96xf32, #tpu.memory_space<vmem>>, vector<8x96xf32>
    %178 = arith.addf %177, %10 : vector<8x96xf32>
    %cst_59 = arith.constant dense<0.000000e+00> : vector<8x96xf32>
    %179 = tpu.matmul %149, %11, %cst_59 {dimension_numbers = #tpu.dot_dimension_numbers<[1], [0], [0], [1], [0, 0, 1, 1], [], []>} : vector<8x32xf32>, vector<32x96xf32>, vector<8x96xf32> -> vector<8x96xf32>
    %180 = arith.addf %179, %16 : vector<8x96xf32>
    %181 = arith.addf %178, %180 : vector<8x96xf32>
    %182 = vector.extract_strided_slice %181 {offsets = [0, 0], sizes = [8, 64], strides = [1, 1]} : vector<8x96xf32> to vector<8x64xf32>
    %183 = arith.negf %182 : vector<8x64xf32>
    %184 = math.exp %183 : vector<8x64xf32>
    %cst_60 = arith.constant 1.000000e+00 : f32
    %185 = vector.broadcast %cst_60 : f32 to vector<8x64xf32>
    %186 = arith.addf %185, %184 : vector<8x64xf32>
    %187 = arith.divf %185, %186 : vector<8x64xf32>
    %188 = vector.extract_strided_slice %187 {offsets = [0, 0], sizes = [8, 32], strides = [1, 1]} : vector<8x64xf32> to vector<8x32xf32>
    %189 = vector.extract_strided_slice %187 {offsets = [0, 32], sizes = [8, 32], strides = [1, 1]} : vector<8x64xf32> to vector<8x32xf32>
    %190 = vector.extract_strided_slice %178 {offsets = [0, 64], sizes = [8, 32], strides = [1, 1]} : vector<8x96xf32> to vector<8x32xf32>
    %191 = vector.extract_strided_slice %180 {offsets = [0, 64], sizes = [8, 32], strides = [1, 1]} : vector<8x96xf32> to vector<8x32xf32>
    %192 = arith.mulf %188, %191 : vector<8x32xf32>
    %193 = arith.addf %190, %192 : vector<8x32xf32>
    %194 = math.tanh %193 : vector<8x32xf32>
    %cst_61 = arith.constant 1.000000e+00 : f32
    %195 = vector.broadcast %cst_61 : f32 to vector<8x32xf32>
    %196 = arith.subf %195, %189 : vector<8x32xf32>
    %197 = arith.mulf %196, %194 : vector<8x32xf32>
    %198 = arith.mulf %189, %149 : vector<8x32xf32>
    %199 = arith.addf %197, %198 : vector<8x32xf32>
    %cst_62 = arith.constant dense<0.000000e+00> : vector<8x128xf32>
    %200 = tpu.matmul %199, %12, %cst_62 {dimension_numbers = #tpu.dot_dimension_numbers<[1], [0], [0], [1], [0, 0, 1, 1], [], []>} : vector<8x32xf32>, vector<32x128xf32>, vector<8x128xf32> -> vector<8x128xf32>
    %cst_63 = arith.constant dense<0.000000e+00> : vector<8x128xf32>
    %201 = tpu.matmul %171, %13, %cst_63 {dimension_numbers = #tpu.dot_dimension_numbers<[1], [0], [0], [1], [0, 0, 1, 1], [], []>} : vector<8x32xf32>, vector<32x128xf32>, vector<8x128xf32> -> vector<8x128xf32>
    %202 = arith.addf %200, %201 : vector<8x128xf32>
    %203 = arith.addf %202, %19 : vector<8x128xf32>
    %204 = vector.extract_strided_slice %203 {offsets = [0, 0], sizes = [8, 64], strides = [1, 1]} : vector<8x128xf32> to vector<8x64xf32>
    %205 = arith.negf %204 : vector<8x64xf32>
    %206 = math.exp %205 : vector<8x64xf32>
    %cst_64 = arith.constant 1.000000e+00 : f32
    %207 = vector.broadcast %cst_64 : f32 to vector<8x64xf32>
    %208 = arith.addf %207, %206 : vector<8x64xf32>
    %209 = arith.divf %207, %208 : vector<8x64xf32>
    %210 = vector.extract_strided_slice %209 {offsets = [0, 0], sizes = [8, 32], strides = [1, 1]} : vector<8x64xf32> to vector<8x32xf32>
    %211 = vector.extract_strided_slice %209 {offsets = [0, 32], sizes = [8, 32], strides = [1, 1]} : vector<8x64xf32> to vector<8x32xf32>
    %212 = vector.extract_strided_slice %203 {offsets = [0, 64], sizes = [8, 32], strides = [1, 1]} : vector<8x128xf32> to vector<8x32xf32>
    %213 = vector.extract_strided_slice %203 {offsets = [0, 96], sizes = [8, 32], strides = [1, 1]} : vector<8x128xf32> to vector<8x32xf32>
    %214 = arith.mulf %210, %213 : vector<8x32xf32>
    %215 = arith.addf %212, %214 : vector<8x32xf32>
    %216 = math.tanh %215 : vector<8x32xf32>
    %cst_65 = arith.constant 1.000000e+00 : f32
    %217 = vector.broadcast %cst_65 : f32 to vector<8x32xf32>
    %218 = arith.subf %217, %211 : vector<8x32xf32>
    %219 = arith.mulf %218, %216 : vector<8x32xf32>
    %220 = arith.mulf %211, %171 : vector<8x32xf32>
    %221 = arith.addf %219, %220 : vector<8x32xf32>
    %222 = arith.index_cast %175 : i32 to index
    %c0_66 = arith.constant 0 : index
    %223 = vector.load %arg15[%222, %c0_66] : memref<64x32xf32, #tpu.memory_space<vmem>>, vector<8x32xf32>
    tpu.vector_store %arg15[%222, %c0_66], %221 {strides = array<i32>} : memref<64x32xf32, #tpu.memory_space<vmem>>, vector<8x32xf32>,
    %c4_i32 = arith.constant 4 : i32
    %c8_i32_67 = arith.constant 8 : i32
    %224 = arith.muli %c4_i32, %c8_i32_67 : i32
    %225 = tpu.assume_multiple %224, 8 : i32
    %226 = arith.index_cast %225 : i32 to index
    %c0_68 = arith.constant 0 : index
    %227 = vector.load %arg14[%226, %c0_68] : memref<64x96xf32, #tpu.memory_space<vmem>>, vector<8x96xf32>
    %228 = arith.addf %227, %10 : vector<8x96xf32>
    %cst_69 = arith.constant dense<0.000000e+00> : vector<8x96xf32>
    %229 = tpu.matmul %199, %11, %cst_69 {dimension_numbers = #tpu.dot_dimension_numbers<[1], [0], [0], [1], [0, 0, 1, 1], [], []>} : vector<8x32xf32>, vector<32x96xf32>, vector<8x96xf32> -> vector<8x96xf32>
    %230 = arith.addf %229, %16 : vector<8x96xf32>
    %231 = arith.addf %228, %230 : vector<8x96xf32>
    %232 = vector.extract_strided_slice %231 {offsets = [0, 0], sizes = [8, 64], strides = [1, 1]} : vector<8x96xf32> to vector<8x64xf32>
    %233 = arith.negf %232 : vector<8x64xf32>
    %234 = math.exp %233 : vector<8x64xf32>
    %cst_70 = arith.constant 1.000000e+00 : f32
    %235 = vector.broadcast %cst_70 : f32 to vector<8x64xf32>
    %236 = arith.addf %235, %234 : vector<8x64xf32>
    %237 = arith.divf %235, %236 : vector<8x64xf32>
    %238 = vector.extract_strided_slice %237 {offsets = [0, 0], sizes = [8, 32], strides = [1, 1]} : vector<8x64xf32> to vector<8x32xf32>
    %239 = vector.extract_strided_slice %237 {offsets = [0, 32], sizes = [8, 32], strides = [1, 1]} : vector<8x64xf32> to vector<8x32xf32>
    %240 = vector.extract_strided_slice %228 {offsets = [0, 64], sizes = [8, 32], strides = [1, 1]} : vector<8x96xf32> to vector<8x32xf32>
    %241 = vector.extract_strided_slice %230 {offsets = [0, 64], sizes = [8, 32], strides = [1, 1]} : vector<8x96xf32> to vector<8x32xf32>
    %242 = arith.mulf %238, %241 : vector<8x32xf32>
    %243 = arith.addf %240, %242 : vector<8x32xf32>
    %244 = math.tanh %243 : vector<8x32xf32>
    %cst_71 = arith.constant 1.000000e+00 : f32
    %245 = vector.broadcast %cst_71 : f32 to vector<8x32xf32>
    %246 = arith.subf %245, %239 : vector<8x32xf32>
    %247 = arith.mulf %246, %244 : vector<8x32xf32>
    %248 = arith.mulf %239, %199 : vector<8x32xf32>
    %249 = arith.addf %247, %248 : vector<8x32xf32>
    %cst_72 = arith.constant dense<0.000000e+00> : vector<8x128xf32>
    %250 = tpu.matmul %249, %12, %cst_72 {dimension_numbers = #tpu.dot_dimension_numbers<[1], [0], [0], [1], [0, 0, 1, 1], [], []>} : vector<8x32xf32>, vector<32x128xf32>, vector<8x128xf32> -> vector<8x128xf32>
    %cst_73 = arith.constant dense<0.000000e+00> : vector<8x128xf32>
    %251 = tpu.matmul %221, %13, %cst_73 {dimension_numbers = #tpu.dot_dimension_numbers<[1], [0], [0], [1], [0, 0, 1, 1], [], []>} : vector<8x32xf32>, vector<32x128xf32>, vector<8x128xf32> -> vector<8x128xf32>
    %252 = arith.addf %250, %251 : vector<8x128xf32>
    %253 = arith.addf %252, %19 : vector<8x128xf32>
    %254 = vector.extract_strided_slice %253 {offsets = [0, 0], sizes = [8, 64], strides = [1, 1]} : vector<8x128xf32> to vector<8x64xf32>
    %255 = arith.negf %254 : vector<8x64xf32>
    %256 = math.exp %255 : vector<8x64xf32>
    %cst_74 = arith.constant 1.000000e+00 : f32
    %257 = vector.broadcast %cst_74 : f32 to vector<8x64xf32>
    %258 = arith.addf %257, %256 : vector<8x64xf32>
    %259 = arith.divf %257, %258 : vector<8x64xf32>
    %260 = vector.extract_strided_slice %259 {offsets = [0, 0], sizes = [8, 32], strides = [1, 1]} : vector<8x64xf32> to vector<8x32xf32>
    %261 = vector.extract_strided_slice %259 {offsets = [0, 32], sizes = [8, 32], strides = [1, 1]} : vector<8x64xf32> to vector<8x32xf32>
    %262 = vector.extract_strided_slice %253 {offsets = [0, 64], sizes = [8, 32], strides = [1, 1]} : vector<8x128xf32> to vector<8x32xf32>
    %263 = vector.extract_strided_slice %253 {offsets = [0, 96], sizes = [8, 32], strides = [1, 1]} : vector<8x128xf32> to vector<8x32xf32>
    %264 = arith.mulf %260, %263 : vector<8x32xf32>
    %265 = arith.addf %262, %264 : vector<8x32xf32>
    %266 = math.tanh %265 : vector<8x32xf32>
    %cst_75 = arith.constant 1.000000e+00 : f32
    %267 = vector.broadcast %cst_75 : f32 to vector<8x32xf32>
    %268 = arith.subf %267, %261 : vector<8x32xf32>
    %269 = arith.mulf %268, %266 : vector<8x32xf32>
    %270 = arith.mulf %261, %221 : vector<8x32xf32>
    %271 = arith.addf %269, %270 : vector<8x32xf32>
    %272 = arith.index_cast %225 : i32 to index
    %c0_76 = arith.constant 0 : index
    %273 = vector.load %arg15[%272, %c0_76] : memref<64x32xf32, #tpu.memory_space<vmem>>, vector<8x32xf32>
    tpu.vector_store %arg15[%272, %c0_76], %271 {strides = array<i32>} : memref<64x32xf32, #tpu.memory_space<vmem>>, vector<8x32xf32>,
    %c5_i32 = arith.constant 5 : i32
    %c8_i32_77 = arith.constant 8 : i32
    %274 = arith.muli %c5_i32, %c8_i32_77 : i32
    %275 = tpu.assume_multiple %274, 8 : i32
    %276 = arith.index_cast %275 : i32 to index
    %c0_78 = arith.constant 0 : index
    %277 = vector.load %arg14[%276, %c0_78] : memref<64x96xf32, #tpu.memory_space<vmem>>, vector<8x96xf32>
    %278 = arith.addf %277, %10 : vector<8x96xf32>
    %cst_79 = arith.constant dense<0.000000e+00> : vector<8x96xf32>
    %279 = tpu.matmul %249, %11, %cst_79 {dimension_numbers = #tpu.dot_dimension_numbers<[1], [0], [0], [1], [0, 0, 1, 1], [], []>} : vector<8x32xf32>, vector<32x96xf32>, vector<8x96xf32> -> vector<8x96xf32>
    %280 = arith.addf %279, %16 : vector<8x96xf32>
    %281 = arith.addf %278, %280 : vector<8x96xf32>
    %282 = vector.extract_strided_slice %281 {offsets = [0, 0], sizes = [8, 64], strides = [1, 1]} : vector<8x96xf32> to vector<8x64xf32>
    %283 = arith.negf %282 : vector<8x64xf32>
    %284 = math.exp %283 : vector<8x64xf32>
    %cst_80 = arith.constant 1.000000e+00 : f32
    %285 = vector.broadcast %cst_80 : f32 to vector<8x64xf32>
    %286 = arith.addf %285, %284 : vector<8x64xf32>
    %287 = arith.divf %285, %286 : vector<8x64xf32>
    %288 = vector.extract_strided_slice %287 {offsets = [0, 0], sizes = [8, 32], strides = [1, 1]} : vector<8x64xf32> to vector<8x32xf32>
    %289 = vector.extract_strided_slice %287 {offsets = [0, 32], sizes = [8, 32], strides = [1, 1]} : vector<8x64xf32> to vector<8x32xf32>
    %290 = vector.extract_strided_slice %278 {offsets = [0, 64], sizes = [8, 32], strides = [1, 1]} : vector<8x96xf32> to vector<8x32xf32>
    %291 = vector.extract_strided_slice %280 {offsets = [0, 64], sizes = [8, 32], strides = [1, 1]} : vector<8x96xf32> to vector<8x32xf32>
    %292 = arith.mulf %288, %291 : vector<8x32xf32>
    %293 = arith.addf %290, %292 : vector<8x32xf32>
    %294 = math.tanh %293 : vector<8x32xf32>
    %cst_81 = arith.constant 1.000000e+00 : f32
    %295 = vector.broadcast %cst_81 : f32 to vector<8x32xf32>
    %296 = arith.subf %295, %289 : vector<8x32xf32>
    %297 = arith.mulf %296, %294 : vector<8x32xf32>
    %298 = arith.mulf %289, %249 : vector<8x32xf32>
    %299 = arith.addf %297, %298 : vector<8x32xf32>
    %cst_82 = arith.constant dense<0.000000e+00> : vector<8x128xf32>
    %300 = tpu.matmul %299, %12, %cst_82 {dimension_numbers = #tpu.dot_dimension_numbers<[1], [0], [0], [1], [0, 0, 1, 1], [], []>} : vector<8x32xf32>, vector<32x128xf32>, vector<8x128xf32> -> vector<8x128xf32>
    %cst_83 = arith.constant dense<0.000000e+00> : vector<8x128xf32>
    %301 = tpu.matmul %271, %13, %cst_83 {dimension_numbers = #tpu.dot_dimension_numbers<[1], [0], [0], [1], [0, 0, 1, 1], [], []>} : vector<8x32xf32>, vector<32x128xf32>, vector<8x128xf32> -> vector<8x128xf32>
    %302 = arith.addf %300, %301 : vector<8x128xf32>
    %303 = arith.addf %302, %19 : vector<8x128xf32>
    %304 = vector.extract_strided_slice %303 {offsets = [0, 0], sizes = [8, 64], strides = [1, 1]} : vector<8x128xf32> to vector<8x64xf32>
    %305 = arith.negf %304 : vector<8x64xf32>
    %306 = math.exp %305 : vector<8x64xf32>
    %cst_84 = arith.constant 1.000000e+00 : f32
    %307 = vector.broadcast %cst_84 : f32 to vector<8x64xf32>
    %308 = arith.addf %307, %306 : vector<8x64xf32>
    %309 = arith.divf %307, %308 : vector<8x64xf32>
    %310 = vector.extract_strided_slice %309 {offsets = [0, 0], sizes = [8, 32], strides = [1, 1]} : vector<8x64xf32> to vector<8x32xf32>
    %311 = vector.extract_strided_slice %309 {offsets = [0, 32], sizes = [8, 32], strides = [1, 1]} : vector<8x64xf32> to vector<8x32xf32>
    %312 = vector.extract_strided_slice %303 {offsets = [0, 64], sizes = [8, 32], strides = [1, 1]} : vector<8x128xf32> to vector<8x32xf32>
    %313 = vector.extract_strided_slice %303 {offsets = [0, 96], sizes = [8, 32], strides = [1, 1]} : vector<8x128xf32> to vector<8x32xf32>
    %314 = arith.mulf %310, %313 : vector<8x32xf32>
    %315 = arith.addf %312, %314 : vector<8x32xf32>
    %316 = math.tanh %315 : vector<8x32xf32>
    %cst_85 = arith.constant 1.000000e+00 : f32
    %317 = vector.broadcast %cst_85 : f32 to vector<8x32xf32>
    %318 = arith.subf %317, %311 : vector<8x32xf32>
    %319 = arith.mulf %318, %316 : vector<8x32xf32>
    %320 = arith.mulf %311, %271 : vector<8x32xf32>
    %321 = arith.addf %319, %320 : vector<8x32xf32>
    %322 = arith.index_cast %275 : i32 to index
    %c0_86 = arith.constant 0 : index
    %323 = vector.load %arg15[%322, %c0_86] : memref<64x32xf32, #tpu.memory_space<vmem>>, vector<8x32xf32>
    tpu.vector_store %arg15[%322, %c0_86], %321 {strides = array<i32>} : memref<64x32xf32, #tpu.memory_space<vmem>>, vector<8x32xf32>,
    %c6_i32 = arith.constant 6 : i32
    %c8_i32_87 = arith.constant 8 : i32
    %324 = arith.muli %c6_i32, %c8_i32_87 : i32
    %325 = tpu.assume_multiple %324, 8 : i32
    %326 = arith.index_cast %325 : i32 to index
    %c0_88 = arith.constant 0 : index
    %327 = vector.load %arg14[%326, %c0_88] : memref<64x96xf32, #tpu.memory_space<vmem>>, vector<8x96xf32>
    %328 = arith.addf %327, %10 : vector<8x96xf32>
    %cst_89 = arith.constant dense<0.000000e+00> : vector<8x96xf32>
    %329 = tpu.matmul %299, %11, %cst_89 {dimension_numbers = #tpu.dot_dimension_numbers<[1], [0], [0], [1], [0, 0, 1, 1], [], []>} : vector<8x32xf32>, vector<32x96xf32>, vector<8x96xf32> -> vector<8x96xf32>
    %330 = arith.addf %329, %16 : vector<8x96xf32>
    %331 = arith.addf %328, %330 : vector<8x96xf32>
    %332 = vector.extract_strided_slice %331 {offsets = [0, 0], sizes = [8, 64], strides = [1, 1]} : vector<8x96xf32> to vector<8x64xf32>
    %333 = arith.negf %332 : vector<8x64xf32>
    %334 = math.exp %333 : vector<8x64xf32>
    %cst_90 = arith.constant 1.000000e+00 : f32
    %335 = vector.broadcast %cst_90 : f32 to vector<8x64xf32>
    %336 = arith.addf %335, %334 : vector<8x64xf32>
    %337 = arith.divf %335, %336 : vector<8x64xf32>
    %338 = vector.extract_strided_slice %337 {offsets = [0, 0], sizes = [8, 32], strides = [1, 1]} : vector<8x64xf32> to vector<8x32xf32>
    %339 = vector.extract_strided_slice %337 {offsets = [0, 32], sizes = [8, 32], strides = [1, 1]} : vector<8x64xf32> to vector<8x32xf32>
    %340 = vector.extract_strided_slice %328 {offsets = [0, 64], sizes = [8, 32], strides = [1, 1]} : vector<8x96xf32> to vector<8x32xf32>
    %341 = vector.extract_strided_slice %330 {offsets = [0, 64], sizes = [8, 32], strides = [1, 1]} : vector<8x96xf32> to vector<8x32xf32>
    %342 = arith.mulf %338, %341 : vector<8x32xf32>
    %343 = arith.addf %340, %342 : vector<8x32xf32>
    %344 = math.tanh %343 : vector<8x32xf32>
    %cst_91 = arith.constant 1.000000e+00 : f32
    %345 = vector.broadcast %cst_91 : f32 to vector<8x32xf32>
    %346 = arith.subf %345, %339 : vector<8x32xf32>
    %347 = arith.mulf %346, %344 : vector<8x32xf32>
    %348 = arith.mulf %339, %299 : vector<8x32xf32>
    %349 = arith.addf %347, %348 : vector<8x32xf32>
    %cst_92 = arith.constant dense<0.000000e+00> : vector<8x128xf32>
    %350 = tpu.matmul %349, %12, %cst_92 {dimension_numbers = #tpu.dot_dimension_numbers<[1], [0], [0], [1], [0, 0, 1, 1], [], []>} : vector<8x32xf32>, vector<32x128xf32>, vector<8x128xf32> -> vector<8x128xf32>
    %cst_93 = arith.constant dense<0.000000e+00> : vector<8x128xf32>
    %351 = tpu.matmul %321, %13, %cst_93 {dimension_numbers = #tpu.dot_dimension_numbers<[1], [0], [0], [1], [0, 0, 1, 1], [], []>} : vector<8x32xf32>, vector<32x128xf32>, vector<8x128xf32> -> vector<8x128xf32>
    %352 = arith.addf %350, %351 : vector<8x128xf32>
    %353 = arith.addf %352, %19 : vector<8x128xf32>
    %354 = vector.extract_strided_slice %353 {offsets = [0, 0], sizes = [8, 64], strides = [1, 1]} : vector<8x128xf32> to vector<8x64xf32>
    %355 = arith.negf %354 : vector<8x64xf32>
    %356 = math.exp %355 : vector<8x64xf32>
    %cst_94 = arith.constant 1.000000e+00 : f32
    %357 = vector.broadcast %cst_94 : f32 to vector<8x64xf32>
    %358 = arith.addf %357, %356 : vector<8x64xf32>
    %359 = arith.divf %357, %358 : vector<8x64xf32>
    %360 = vector.extract_strided_slice %359 {offsets = [0, 0], sizes = [8, 32], strides = [1, 1]} : vector<8x64xf32> to vector<8x32xf32>
    %361 = vector.extract_strided_slice %359 {offsets = [0, 32], sizes = [8, 32], strides = [1, 1]} : vector<8x64xf32> to vector<8x32xf32>
    %362 = vector.extract_strided_slice %353 {offsets = [0, 64], sizes = [8, 32], strides = [1, 1]} : vector<8x128xf32> to vector<8x32xf32>
    %363 = vector.extract_strided_slice %353 {offsets = [0, 96], sizes = [8, 32], strides = [1, 1]} : vector<8x128xf32> to vector<8x32xf32>
    %364 = arith.mulf %360, %363 : vector<8x32xf32>
    %365 = arith.addf %362, %364 : vector<8x32xf32>
    %366 = math.tanh %365 : vector<8x32xf32>
    %cst_95 = arith.constant 1.000000e+00 : f32
    %367 = vector.broadcast %cst_95 : f32 to vector<8x32xf32>
    %368 = arith.subf %367, %361 : vector<8x32xf32>
    %369 = arith.mulf %368, %366 : vector<8x32xf32>
    %370 = arith.mulf %361, %321 : vector<8x32xf32>
    %371 = arith.addf %369, %370 : vector<8x32xf32>
    %372 = arith.index_cast %325 : i32 to index
    %c0_96 = arith.constant 0 : index
    %373 = vector.load %arg15[%372, %c0_96] : memref<64x32xf32, #tpu.memory_space<vmem>>, vector<8x32xf32>
    tpu.vector_store %arg15[%372, %c0_96], %371 {strides = array<i32>} : memref<64x32xf32, #tpu.memory_space<vmem>>, vector<8x32xf32>,
    %c7_i32 = arith.constant 7 : i32
    %c8_i32_97 = arith.constant 8 : i32
    %374 = arith.muli %c7_i32, %c8_i32_97 : i32
    %375 = tpu.assume_multiple %374, 8 : i32
    %376 = arith.index_cast %375 : i32 to index
    %c0_98 = arith.constant 0 : index
    %377 = vector.load %arg14[%376, %c0_98] : memref<64x96xf32, #tpu.memory_space<vmem>>, vector<8x96xf32>
    %378 = arith.addf %377, %10 : vector<8x96xf32>
    %cst_99 = arith.constant dense<0.000000e+00> : vector<8x96xf32>
    %379 = tpu.matmul %349, %11, %cst_99 {dimension_numbers = #tpu.dot_dimension_numbers<[1], [0], [0], [1], [0, 0, 1, 1], [], []>} : vector<8x32xf32>, vector<32x96xf32>, vector<8x96xf32> -> vector<8x96xf32>
    %380 = arith.addf %379, %16 : vector<8x96xf32>
    %381 = arith.addf %378, %380 : vector<8x96xf32>
    %382 = vector.extract_strided_slice %381 {offsets = [0, 0], sizes = [8, 64], strides = [1, 1]} : vector<8x96xf32> to vector<8x64xf32>
    %383 = arith.negf %382 : vector<8x64xf32>
    %384 = math.exp %383 : vector<8x64xf32>
    %cst_100 = arith.constant 1.000000e+00 : f32
    %385 = vector.broadcast %cst_100 : f32 to vector<8x64xf32>
    %386 = arith.addf %385, %384 : vector<8x64xf32>
    %387 = arith.divf %385, %386 : vector<8x64xf32>
    %388 = vector.extract_strided_slice %387 {offsets = [0, 0], sizes = [8, 32], strides = [1, 1]} : vector<8x64xf32> to vector<8x32xf32>
    %389 = vector.extract_strided_slice %387 {offsets = [0, 32], sizes = [8, 32], strides = [1, 1]} : vector<8x64xf32> to vector<8x32xf32>
    %390 = vector.extract_strided_slice %378 {offsets = [0, 64], sizes = [8, 32], strides = [1, 1]} : vector<8x96xf32> to vector<8x32xf32>
    %391 = vector.extract_strided_slice %380 {offsets = [0, 64], sizes = [8, 32], strides = [1, 1]} : vector<8x96xf32> to vector<8x32xf32>
    %392 = arith.mulf %388, %391 : vector<8x32xf32>
    %393 = arith.addf %390, %392 : vector<8x32xf32>
    %394 = math.tanh %393 : vector<8x32xf32>
    %cst_101 = arith.constant 1.000000e+00 : f32
    %395 = vector.broadcast %cst_101 : f32 to vector<8x32xf32>
    %396 = arith.subf %395, %389 : vector<8x32xf32>
    %397 = arith.mulf %396, %394 : vector<8x32xf32>
    %398 = arith.mulf %389, %349 : vector<8x32xf32>
    %399 = arith.addf %397, %398 : vector<8x32xf32>
    %cst_102 = arith.constant dense<0.000000e+00> : vector<8x128xf32>
    %400 = tpu.matmul %399, %12, %cst_102 {dimension_numbers = #tpu.dot_dimension_numbers<[1], [0], [0], [1], [0, 0, 1, 1], [], []>} : vector<8x32xf32>, vector<32x128xf32>, vector<8x128xf32> -> vector<8x128xf32>
    %cst_103 = arith.constant dense<0.000000e+00> : vector<8x128xf32>
    %401 = tpu.matmul %371, %13, %cst_103 {dimension_numbers = #tpu.dot_dimension_numbers<[1], [0], [0], [1], [0, 0, 1, 1], [], []>} : vector<8x32xf32>, vector<32x128xf32>, vector<8x128xf32> -> vector<8x128xf32>
    %402 = arith.addf %400, %401 : vector<8x128xf32>
    %403 = arith.addf %402, %19 : vector<8x128xf32>
    %404 = vector.extract_strided_slice %403 {offsets = [0, 0], sizes = [8, 64], strides = [1, 1]} : vector<8x128xf32> to vector<8x64xf32>
    %405 = arith.negf %404 : vector<8x64xf32>
    %406 = math.exp %405 : vector<8x64xf32>
    %cst_104 = arith.constant 1.000000e+00 : f32
    %407 = vector.broadcast %cst_104 : f32 to vector<8x64xf32>
    %408 = arith.addf %407, %406 : vector<8x64xf32>
    %409 = arith.divf %407, %408 : vector<8x64xf32>
    %410 = vector.extract_strided_slice %409 {offsets = [0, 0], sizes = [8, 32], strides = [1, 1]} : vector<8x64xf32> to vector<8x32xf32>
    %411 = vector.extract_strided_slice %409 {offsets = [0, 32], sizes = [8, 32], strides = [1, 1]} : vector<8x64xf32> to vector<8x32xf32>
    %412 = vector.extract_strided_slice %403 {offsets = [0, 64], sizes = [8, 32], strides = [1, 1]} : vector<8x128xf32> to vector<8x32xf32>
    %413 = vector.extract_strided_slice %403 {offsets = [0, 96], sizes = [8, 32], strides = [1, 1]} : vector<8x128xf32> to vector<8x32xf32>
    %414 = arith.mulf %410, %413 : vector<8x32xf32>
    %415 = arith.addf %412, %414 : vector<8x32xf32>
    %416 = math.tanh %415 : vector<8x32xf32>
    %cst_105 = arith.constant 1.000000e+00 : f32
    %417 = vector.broadcast %cst_105 : f32 to vector<8x32xf32>
    %418 = arith.subf %417, %411 : vector<8x32xf32>
    %419 = arith.mulf %418, %416 : vector<8x32xf32>
    %420 = arith.mulf %411, %371 : vector<8x32xf32>
    %421 = arith.addf %419, %420 : vector<8x32xf32>
    %422 = arith.index_cast %375 : i32 to index
    %c0_106 = arith.constant 0 : index
    %423 = vector.load %arg15[%422, %c0_106] : memref<64x32xf32, #tpu.memory_space<vmem>>, vector<8x32xf32>
    tpu.vector_store %arg15[%422, %c0_106], %421 {strides = array<i32>} : memref<64x32xf32, #tpu.memory_space<vmem>>, vector<8x32xf32>,
    %c8_i32_107 = arith.constant 8 : i32
    %c0_108 = arith.constant 0 : index
    %c0_109 = arith.constant 0 : index
    %c0_110 = arith.constant 0 : index
    %424 = vector.load %arg13[%c0_108, %c0_109, %c0_110] : memref<2x8x32xf32, #tpu.memory_space<vmem>>, vector<1x8x32xf32>
    %425 = vector.shape_cast %424 : vector<1x8x32xf32> to vector<8x32xf32>
    %426 = vector.shape_cast %399 : vector<8x32xf32> to vector<1x8x32xf32>
    tpu.vector_store %arg13[%c0_108, %c0_109, %c0_110], %426 {strides = array<i32>} : memref<2x8x32xf32, #tpu.memory_space<vmem>>, vector<1x8x32xf32>,
    %c1_111 = arith.constant 1 : index
    %c0_112 = arith.constant 0 : index
    %c0_113 = arith.constant 0 : index
    %427 = vector.load %arg13[%c1_111, %c0_112, %c0_113] : memref<2x8x32xf32, #tpu.memory_space<vmem>>, vector<1x8x32xf32>
    %428 = vector.shape_cast %427 : vector<1x8x32xf32> to vector<8x32xf32>
    %429 = vector.shape_cast %421 : vector<8x32xf32> to vector<1x8x32xf32>
    tpu.vector_store %arg13[%c1_111, %c0_112, %c0_113], %429 {strides = array<i32>} : memref<2x8x32xf32, #tpu.memory_space<vmem>>, vector<1x8x32xf32>,
    %c0_114 = arith.constant 0 : index
    %c0_115 = arith.constant 0 : index
    %430 = vector.load %arg15[%c0_114, %c0_115] : memref<64x32xf32, #tpu.memory_space<vmem>>, vector<64x32xf32>
    %c0_116 = arith.constant 0 : index
    %c0_117 = arith.constant 0 : index
    %431 = vector.load %arg10[%c0_116, %c0_117] : memref<32x128xf32, #tpu.memory_space<vmem>>, vector<32x128xf32>
    %cst_118 = arith.constant dense<0.000000e+00> : vector<64x128xf32>
    %432 = tpu.matmul %430, %431, %cst_118 {dimension_numbers = #tpu.dot_dimension_numbers<[1], [0], [0], [1], [0, 0, 1, 1], [], []>} : vector<64x32xf32>, vector<32x128xf32>, vector<64x128xf32> -> vector<64x128xf32>
    %c0_119 = arith.constant 0 : index
    %c0_120 = arith.constant 0 : index
    %433 = vector.load %arg11[%c0_119, %c0_120] : memref<1x128xf32, #tpu.memory_space<vmem>>, vector<1x128xf32>
    %434 = vector.broadcast %433 : vector<1x128xf32> to vector<64x128xf32>
    %435 = arith.addf %432, %434 : vector<64x128xf32>
    %c0_121 = arith.constant 0 : index
    %c0_122 = arith.constant 0 : index
    %436 = vector.load %arg12[%c0_121, %c0_122] : memref<64x128xf32, #tpu.memory_space<vmem>>, vector<64x128xf32>
    tpu.vector_store %arg12[%c0_121, %c0_122], %435 {strides = array<i32>} : memref<64x128xf32, #tpu.memory_space<vmem>>, vector<64x128xf32>,
    return
  }
}

</mosaic_0001>

<bundles_post_ra>
// kernel: decoder_forward.1
= control target key start
LH: loop header
LB: loop body
LE: loop exit
PB: predicated region body
PF: predicated region fallthrough
CT: control target
= control target key end

     0   :  { %vm53_vm0 = vcmask 130048   ;;  %v3490_v0 = vmov 0.0|0.0   ;;  %vm3491_vm1 = vmmov 0   ;;  %v3492_v4 = vmov 0.0   ;;  %s3495_s25 = smov 32   ;;  %s4088_s2 = inlined_call_operand.vmem [shape: f32[16,96], index: 2, kind: input, shape index: {}]   ;;  %s4089_s5 = inlined_call_operand.vmem [shape: f32[32,96], index: 5, kind: input, shape index: {}]   ;;  %s4090_s0 = inlined_call_operand.vmem [shape: f32[64,16], index: 0, kind: input, shape index: {}]   ;;  %s4091_s3 = inlined_call_operand.vmem [shape: f32[32,96], index: 3, kind: input, shape index: {}]   ;;  %s4092_s1 = inlined_call_operand.vmem [shape: f32[2,8,32], index: 1, kind: input, shape index: {}]   ;;  %s4093_s6 = inlined_call_operand.vmem [shape: f32[1,96], index: 6, kind: input, shape index: {}]   ;;  %s4094_s4 = inlined_call_operand.vmem [shape: f32[1,96], index: 4, kind: input, shape index: {}]   ;;  %s4095_s8 = inlined_call_operand.vmem [shape: f32[32,128], index: 8, kind: input, shape index: {}]   ;;  %s4096_s7 = inlined_call_operand.vmem [shape: f32[32,128], index: 7, kind: input, shape index: {}]   ;;  %s4097_s9 = inlined_call_operand.vmem [shape: f32[1,128], index: 9, kind: input, shape index: {}]   ;;  %s4098_s10 = inlined_call_operand.vmem [shape: f32[32,128], index: 10, kind: input, shape index: {}]   ;;  %s4099_s13 = inlined_call_operand.vmem [shape: f32[2,8,32], index: 13, kind: output, shape index: {1}]   ;;  %s4100_s11 = inlined_call_operand.vmem [shape: f32[1,128], index: 11, kind: input, shape index: {}]   ;;  %s4101_s12 = inlined_call_operand.vmem [shape: f32[64,128], index: 12, kind: output, shape index: {0}]  }
   0x1   :  { %3234 = vmatprep.subr.bf16.mxu1 %v3490_v0  ;;  %v51_v1 = vld [vmem:[%s4088_s2] sm:$0xff]  ;;  %v52_v2 = vld [vmem:[%s4088_s2 + $0x8] sm:$0xff]  ;;  %2948 = vmatprep.mubr.msk.f32.mxu1 %vm3491_vm1, %v3492_v4  ;;  %v281_v9 = vld [vmem:[%s4089_s5 + $0x10] sm:$0xff]  ;;  %vm205_vm2 = vcmask 261120   ;;  %vm183_vm3 = vcmask 785408  }
   0x2   :  { %v279_v3 = vld [vmem:[%s4089_s5] sm:$0xff]  ;;  %v3224_v5 = vpack.c.bf16 %v52_v2, %v51_v1  ;;  %v280_v6 = vld [vmem:[%s4089_s5 + $0x8] sm:$0xff]  ;;  %v282_v10 = vld [vmem:[%s4089_s5 + $0x18] sm:$0xff] }
   0x3   :  { %v43_v7 = vld [vmem:[%s4090_s0] sm:$0xff]  ;;  %v3584_v8 = vpack.c.bf16 %v280_v6, %v279_v3  ;;  %v44_v11 = vld [vmem:[%s4090_s0 + $0x8] sm:$0xff]  ;;  %v3597_v12 = vpack.c.bf16 %v282_v10, %v281_v9  ;;  %v45_v14 = vld [vmem:[%s4090_s0 + $0x10] sm:$0xff] }
   0x4   :  { %2917 = vmatprep.mubr.msk.f32.mxu0 %vm53_vm0, %v43_v7  ;;  %3225 = vmatprep.subr.bf16.mxu0 %v3224_v5  ;;  %v194_v13 = vld [vmem:[%s4091_s3] sm:$0xff]  ;;  %v195_v15 = vld [vmem:[%s4091_s3 + $0x8] sm:$0xff]  ;;  %v196_v17 = vld [vmem:[%s4091_s3 + $0x10] sm:$0xff] }
   0x5   :  { %3236 = vmatpush3.bf16.msra.mxu1 %v3584_v8  ;;  %3227 = vmatpush3.bf16.msra.mxu0 %v3224_v5  ;;  %v3229_v16 = vpack.c.bf16 %v195_v15, %v194_v13  ;;  %v197_v18 = vld [vmem:[%s4091_s3 + $0x18] sm:$0xff]  ;;  %v3622_v19 = vld [vmem:[%s4092_s1] sm:$0xff]  ;;  %v48_v23 = vld [vmem:[%s4090_s0 + $0x28] sm:$0xff] }
   0x6   :  { %3237 = vmatprep.subr.bf16.mxu1 %v3490_v0  ;;  %3228 = vmatprep.subr.bf16.mxu0 %v3490_v0  ;;  %v46_v20 = vld [vmem:[%s4090_s0 + $0x18] sm:$0xff]  ;;  %v47_v21 = vld [vmem:[%s4090_s0 + $0x20] sm:$0xff]  ;;  %v3232_v22 = vpack.c.bf16 %v197_v18, %v196_v17  ;;  %v49_v24 = vld [vmem:[%s4090_s0 + $0x30] sm:$0xff] }
   0x7   :  { %v50_v25 = vld [vmem:[%s4090_s0 + $0x38] sm:$0xff]  ;;  %v3654_v26 = vld [vmem:[%s4092_s1 + $0x8] sm:$0xff]  ;;  %v3666_v29 = vld [vmem:[%s4093_s6] ss:$0 sm:$0xff]  ;;  %s3493_s1 = smov 64  }
   0x8   :  { %2918 = vmatmul.mubr.msk.f32.vlgmr.msra.gmra.mrb[0].mxu0 %vm53_vm0, %v44_v11  ;;  %v2712_v41 = vld [vmem:[%s4094_s4] ss:$0 sm:$0xff]  ;;  %v288_v55 = vld [vmem:[%s4095_s8 + $0x8] sm:$0xff]  ;;  %v289_v56 = vld [vmem:[%s4095_s8 + $0x10] sm:$0xff] }
   0x9   :  { %3239 = vmatpush3.bf16.msra.mxu1 %v3597_v12  ;;  %2920 = vmatprep.mubr.msk.f32.mxu0 %vm53_vm0, %v45_v14  ;;  %v287_v54 = vld [vmem:[%s4095_s8] sm:$0xff]  ;;  %v290_v58 = vld [vmem:[%s4095_s8 + $0x18] sm:$0xff]  ;;  %v284_v60 = vld [vmem:[%s4096_s7 + $0x8] sm:$0xff]  ;;  %s3494_s8 = smov 96  }
   0xa   :  { %3230 = vmatpush3.bf16.msra.mxu0 %v3229_v16  ;;  %3246 = vmatprep.subr.bf16.mxu1 %v3490_v0  ;;  %v3693_v57 = vpack.c.bf16 %v288_v55, %v287_v54  ;;  %v283_v59 = vld [vmem:[%s4096_s7] sm:$0xff]  ;;  %v285_v62 = vld [vmem:[%s4096_s7 + $0x10] sm:$0xff]  ;;  %v286_v63 = vld [vmem:[%s4096_s7 + $0x18] sm:$0xff]  ;;  %v3713_v2 = vpack.c.bf16 %v290_v58, %v289_v56 }
   0xb   :  { %3231 = vmatprep.subr.bf16.mxu0 %v3490_v0  ;;  %v3704_v61 = vpack.c.bf16 %v284_v60, %v283_v59  ;;  %v3718_v3 = vpack.c.bf16 %v286_v63, %v285_v62  ;;  %v3756_v16 = vld [vmem:[%s4097_s9] ss:$0 sm:$0xff] }
   0xc   :  { %2949 = vmatmul.mubr.msk.f32.vlgmr.msra.gmra.mrb[0].mxu1 %vm205_vm2, %v3622_v19  ;;  %2921 = vmatmul.mubr.msk.f32.gmra.mrb[2].mxu0 %vm53_vm0, %v46_v20 }
   0xd   :  { %2923 = vmatprep.mubr.msk.f32.mxu0 %vm53_vm0, %v47_v21  ;;  %2970 = vmatprep.mubr.msk.f32.mxu1 %vm3491_vm1, %v3492_v4 }
   0xe   :  { %3233 = vmatpush3.bf16.msra.mxu0 %v3232_v22  ;;  %3248 = vmatpush3.bf16.msra.mxu1 %v3704_v61 }
   0xf   :  { %3240 = vmatprep.subr.bf16.mxu0 %v3490_v0  ;;  %3249 = vmatprep.subr.bf16.mxu1 %v3490_v0 }
  0x10   :  { %2924 = vmatmul.mubr.msk.f32.gmra.mrb[4].mxu0 %vm53_vm0, %v48_v23 }
  0x11   :  { %2926 = vmatprep.mubr.msk.f32.mxu0 %vm53_vm0, %v49_v24 }
  0x12   :  { %3251 = vmatpush3.bf16.msra.mxu1 %v3718_v3 }
  0x13   :  { %3258 = vmatprep.subr.bf16.mxu1 %v3490_v0 }
  0x14   :  { %2927 = vmatmul.mubr.msk.f32.gmra.mrb[6].mxu0 %vm53_vm0, %v50_v25 }
  0x15   :  { %2937 = vmatprep.mubr.msk.f32.mxu0 %vm3491_vm1, %v3492_v4 }
  0x18   :  { %2938 = vmatmul.mubr.msk.f32.vlgmr.msra.gmra.mrb[8].mxu0 %vm205_vm2, %v3654_v26 }
  0x19   :  { %2959 = vmatprep.mubr.msk.f32.mxu0 %vm3491_vm1, %v3492_v4  ;;  %3242 = vmatpush3.bf16.msra.mxu0 %v3693_v57 }
  0x1a   :  { %3243 = vmatprep.subr.bf16.mxu0 %v3490_v0 }
  0x1d   :  { %3245 = vmatpush3.bf16.msra.mxu0 %v3713_v2 }
  0x1e   :  { %3252 = vmatprep.subr.bf16.mxu0 %v3490_v0 }
  0x20   :  { %2960 = vmatmul.mubr.msk.f32.vlgmr.msra.gmra.mrb[10].mxu0 %vm205_vm2, %v3654_v26 }
  0x21   :  { %3254 = vmatpush3.bf16.msra.mxu0 %v3584_v8  ;;  %2981 = vmatprep.mubr.msk.f32.mxu0 %vm3491_vm1, %v3492_v4 }
  0x22   :  { %3255 = vmatprep.subr.bf16.mxu0 %v3490_v0 }
  0x25   :  { %3257 = vmatpush3.bf16.msra.mxu0 %v3597_v12 }
  0x26   :  { %3264 = vmatprep.subr.bf16.mxu0 %v3490_v0 }
  0xdb   :  { %v2919_v27 = vpop.f32.mrb[0].mxu0 }
  0xdc   :  { %185 = vst.msk [vmem:[#allocation2 + $0x8] sm:$0xff] %vm183_vm3, %v2919_v27  ;;  %v144_v28 = vpop.f32.mrb[1].mxu0 }
  0xdd   :  { %184 = vst.msk [vmem:[#allocation2] sm:$0xff] %vm183_vm3, %v144_v28 }
  0xdf   :  { %v377_v30 = vpop.f32.mrb[0].mxu1  ;;  %v2922_v31 = vpop.f32.mrb[2].mxu0 }
  0xe0   :  { %v378_v32 = vadd.f32 %v3666_v29, %v377_v30  ;;  %v2950_v33 = vpop.f32.mrb[1].mxu1  ;;  %187 = vst.msk [vmem:[#allocation2 + $0x18] sm:$0xff] %vm183_vm3, %v2922_v31  ;;  %v154_v34 = vpop.f32.mrb[3].mxu0 }
  0xe1   :  { %186 = vst.msk [vmem:[#allocation2 + $0x10] sm:$0xff] %vm183_vm3, %v154_v34 }
  0xe2   :  { %389 = vrot.lane.b32.xlu0 %v378_v32, %s3493_s1 }
  0xe3   :  { %v2925_v35 = vpop.f32.mrb[4].mxu0  ;;  %v590_v24 = vld [vmem:[#allocation2 + $0x8] sm:$0xff] }
  0xe4   :  { %189 = vst.msk [vmem:[#allocation2 + $0x28] sm:$0xff] %vm183_vm3, %v2925_v35  ;;  %v164_v36 = vpop.f32.mrb[5].mxu0  ;;  %v306_v43 = vld [vmem:[#allocation2] sm:$0xff] }
  0xe5   :  { %188 = vst.msk [vmem:[#allocation2 + $0x20] sm:$0xff] %vm183_vm3, %v164_v36 }
  0xe7   :  { %v2928_v37 = vpop.f32.mrb[6].mxu0 }
  0xe8   :  { %191 = vst.msk [vmem:[#allocation2 + $0x38] sm:$0xff] %vm183_vm3, %v2928_v37  ;;  %v174_v38 = vpop.f32.mrb[7].mxu0 }
  0xe9   :  { %190 = vst.msk [vmem:[#allocation2 + $0x30] sm:$0xff] %vm183_vm3, %v174_v38 }
  0xeb   :  { %v275_v39 = vpop.f32.mrb[8].mxu0 }
  0xec   :  { %v2939_v40 = vpop.f32.mrb[9].mxu0  ;;  %v3680_v42 = vadd.f32 %v2712_v41, %v275_v39 }
  0xee   :  { %v307_v44 = vadd.f32 %v306_v43, %v3680_v42  ;;  %v591_v25 = vadd.f32 %v590_v24, %v3680_v42 }
  0xf0   :  { %v381_v45 = vadd.f32 %v378_v32, %v307_v44 }
  0xf2   :  { %v2717_v46 = vmul.f32 -1.442695, %v381_v45 }
  0xf3   :  { %v476_v13 = vpop.f32.mrb[10].mxu0 }
  0xf4   :  { %3392 = vpow2.f32 %v2717_v46  ;;  %v2961_v14 = vpop.f32.mrb[11].mxu0 }
  0xfe   :  { %v3393_v47 = vpop.eup %3392 }
  0xff   :  { %v385_v48 = vadd.f32 1.0, %v3393_v47 }
 0x101   :  { %3394 = vrcp.f32 %v385_v48 }
 0x10b   :  { %v3395_v49 = vpop.eup %3394 }
 0x10c   :  { %v399_v6 = vsub.f32 1.0, %v3395_v49 }
 0x154   :  { %v390_v50 = vpop.permute.xlu0 %389 }
 0x155   :  { %v392_v51 = vmul.f32 %v3395_v49, %v390_v50 }
 0x157   :  { %394 = vrot.lane.b32.xlu0 %v392_v51, %s3493_s1 }
 0x1c9   :  { %v395_v52 = vpop.permute.xlu0 %394 }
 0x1ca   :  { %v397_v53 = vadd.f32 %v395_v52, %v307_v44 }
 0x1cc   :  { %3396 = vtanh.f32 %v397_v53 }
 0x1d6   :  { %v3397_v1 = vpop.eup %3396 }
 0x1d7   :  { %401 = vrot.lane.b32.xlu1 %v3397_v1, %s3494_s8 }
 0x1db   :  { %405 = vrot.lane.b32.xlu1 %v3622_v19, %s3495_s25 }
 0x249   :  { %v402_v5 = vpop.permute.xlu1 %401 }
 0x24a   :  { %v404_v9 = vmul.f32 %v402_v5, %v399_v6 }
 0x24d   :  { %v406_v7 = vpop.permute.xlu1 %405 }
 0x24e   :  { %v408_v10 = vmul.f32 %v3395_v49, %v406_v7 }
 0x250   :  { %v3735_v11 = vadd.f32 %v408_v10, %v404_v9 }
 0x252   :  { %481 = vrot.lane.b32.xlu0 %v3735_v11, %s3494_s8 }
 0x2c4   :  { %v482_v15 = vpop.permute.xlu0 %481 }
 0x2c5   :  { %2971 = vmatmul.mubr.msk.f32.vlgmr.msra.gmra.mrb[2].mxu1 %vm205_vm2, %v482_v15  ;;  %2982 = vmatmul.mubr.msk.f32.vlgmr.msra.gmra.mrb[12].mxu0 %vm205_vm2, %v482_v15 }
 0x2c6   :  { %3260 = vmatpush3.bf16.msra.mxu1 %v3693_v57  ;;  %3266 = vmatpush3.bf16.msra.mxu0 %v3704_v61 }
 0x2c7   :  { %3261 = vmatprep.subr.bf16.mxu1 %v3490_v0  ;;  %2992 = vmatprep.mubr.msk.f32.mxu1 %vm3491_vm1, %v3492_v4 }
 0x2c8   :  { %3267 = vmatprep.subr.bf16.mxu0 %v3490_v0  ;;  %3003 = vmatprep.mubr.msk.f32.mxu0 %vm3491_vm1, %v3492_v4 }
 0x2ca   :  { %3263 = vmatpush3.bf16.msra.mxu1 %v3713_v2  ;;  %3269 = vmatpush3.bf16.msra.mxu0 %v3718_v3 }
 0x2cb   :  { %3270 = vmatprep.subr.bf16.mxu1 %v3490_v0  ;;  %3276 = vmatprep.subr.bf16.mxu0 %v3490_v0 }
 0x398   :  { %v551_v17 = vpop.f32.mrb[2].mxu1  ;;  %v658_v18 = vpop.f32.mrb[12].mxu0 }
 0x399   :  { %v552_v19 = vadd.f32 %v551_v17, %v476_v13  ;;  %v659_v20 = vadd.f32 %v3666_v29, %v658_v18  ;;  %v2972_v21 = vpop.f32.mrb[3].mxu1  ;;  %v2983_v22 = vpop.f32.mrb[13].mxu0  ;;  %v868_v13 = vld [vmem:[#allocation2 + $0x10] sm:$0xff] }
 0x39a   :  { %v869_v14 = vadd.f32 %v868_v13, %v3680_v42 }
 0x39b   :  { %v555_v23 = vadd.f32 %v3756_v16, %v552_v19  ;;  %670 = vrot.lane.b32.xlu0 %v659_v20, %s3493_s1  ;;  %v662_v27 = vadd.f32 %v659_v20, %v591_v25 }
 0x39d   :  { %563 = vrot.lane.b32.xlu1 %v555_v23, %s3495_s25  ;;  %v2722_v28 = vmul.f32 -1.442695, %v662_v27  ;;  %v2720_v30 = vmul.f32 -1.442695, %v555_v23 }
 0x39f   :  { %3398 = vpow2.f32 %v2722_v28 }
 0x3a0   :  { %3400 = vpow2.f32 %v2720_v30 }
 0x3a9   :  { %v3399_v31 = vpop.eup %3398 }
 0x3aa   :  { %v3401_v32 = vpop.eup %3400  ;;  %v666_v33 = vadd.f32 1.0, %v3399_v31 }
 0x3ab   :  { %v559_v34 = vadd.f32 1.0, %v3401_v32 }
 0x3ac   :  { %3402 = vrcp.f32 %v666_v33 }
 0x3ad   :  { %3404 = vrcp.f32 %v559_v34 }
 0x3b6   :  { %v3403_v35 = vpop.eup %3402 }
 0x3b7   :  { %v3405_v38 = vpop.eup %3404  ;;  %v686_v55 = vmul.f32 %v3403_v35, %v3735_v11 }
 0x3b8   :  { %v573_v49 = vsub.f32 1.0, %v3405_v38 }
 0x40d   :  { %v671_v36 = vpop.permute.xlu0 %670 }
 0x40e   :  { %v673_v37 = vmul.f32 %v3403_v35, %v671_v36 }
 0x40f   :  { %v564_v39 = vpop.permute.xlu1 %563 }
 0x410   :  { %v566_v40 = vmul.f32 %v3405_v38, %v564_v39  ;;  %675 = vrot.lane.b32.xlu0 %v673_v37, %s3493_s1 }
 0x412   :  { %568 = vrot.lane.b32.xlu1 %v566_v40, %s3493_s1 }
 0x414   :  { %579 = vrot.lane.b32.xlu0 %v3654_v26, %s3495_s25  ;;  %v680_v26 = vsub.f32 1.0, %v3403_v35 }
 0x482   :  { %v676_v41 = vpop.permute.xlu0 %675 }
 0x483   :  { %v678_v45 = vadd.f32 %v676_v41, %v591_v25 }
 0x484   :  { %v569_v43 = vpop.permute.xlu1 %568 }
 0x485   :  { %v571_v44 = vadd.f32 %v569_v43, %v555_v23 }
 0x486   :  { %v580_v48 = vpop.permute.xlu0 %579 }
 0x487   :  { %3406 = vtanh.f32 %v571_v44  ;;  %v582_v51 = vmul.f32 %v3405_v38, %v580_v48 }
 0x488   :  { %3408 = vtanh.f32 %v678_v45 }
 0x491   :  { %v3407_v46 = vpop.eup %3406 }
 0x492   :  { %575 = vrot.lane.b32.xlu1 %v3407_v46, %s3494_s8  ;;  %v3409_v47 = vpop.eup %3408 }
 0x496   :  { %682 = vrot.lane.b32.xlu1 %v3409_v47, %s3494_s8 }
 0x504   :  { %v576_v50 = vpop.permute.xlu1 %575 }
 0x505   :  { %v578_v52 = vmul.f32 %v576_v50, %v573_v49 }
 0x507   :  { %v3769_v53 = vadd.f32 %v582_v51, %v578_v52 }
 0x508   :  { %v683_v54 = vpop.permute.xlu1 %682 }
 0x509   :  { %v685_v56 = vmul.f32 %v683_v54, %v680_v26  ;;  %585 = vrot.lane.b32.xlu0 %v3769_v53, %s3494_s8 }
 0x50b   :  { %v3774_v58 = vadd.f32 %v686_v55, %v685_v56 }
 0x50d   :  { %761 = vrot.lane.b32.xlu1 %v3774_v58, %s3494_s8 }
 0x57b   :  { %v586_v59 = vpop.permute.xlu0 %585 }
 0x57c   :  { %588 = vst.msk [vmem:[#allocation3] sm:$0xff] %vm205_vm2, %v586_v59  ;;  %2993 = vmatmul.mubr.msk.f32.vlgmr.msra.gmra.mrb[4].mxu1 %vm205_vm2, %v586_v59  ;;  %v1146_v59 = vld [vmem:[#allocation2 + $0x18] sm:$0xff] }
 0x57d   :  { %3272 = vmatpush3.bf16.msra.mxu1 %v3584_v8  ;;  %3014 = vmatprep.mubr.msk.f32.mxu1 %vm3491_vm1, %v3492_v4 }
 0x57e   :  { %3273 = vmatprep.subr.bf16.mxu1 %v3490_v0 }
 0x57f   :  { %v762_v60 = vpop.permute.xlu1 %761 }
 0x580   :  { %3004 = vmatmul.mubr.msk.f32.vlgmr.msra.gmra.mrb[14].mxu0 %vm205_vm2, %v762_v60 }
 0x581   :  { %3275 = vmatpush3.bf16.msra.mxu1 %v3597_v12  ;;  %3278 = vmatpush3.bf16.msra.mxu0 %v3693_v57 }
 0x582   :  { %3282 = vmatprep.subr.bf16.mxu1 %v3490_v0  ;;  %3279 = vmatprep.subr.bf16.mxu0 %v3490_v0 }
 0x583   :  { %3025 = vmatprep.mubr.msk.f32.mxu0 %vm3491_vm1, %v3492_v4 }
 0x584   :  { %3015 = vmatmul.mubr.msk.f32.vlgmr.msra.gmra.mrb[6].mxu1 %vm205_vm2, %v762_v60  ;;  %v1147_v60 = vadd.f32 %v1146_v59, %v3680_v42 }
 0x585   :  { %3284 = vmatpush3.bf16.msra.mxu1 %v3704_v61  ;;  %3281 = vmatpush3.bf16.msra.mxu0 %v3713_v2 }
 0x586   :  { %3285 = vmatprep.subr.bf16.mxu1 %v3490_v0  ;;  %3288 = vmatprep.subr.bf16.mxu0 %v3490_v0 }
 0x587   :  { %3036 = vmatprep.mubr.msk.f32.mxu1 %vm3491_vm1, %v3492_v4 }
 0x589   :  { %3287 = vmatpush3.bf16.msra.mxu1 %v3718_v3 }
 0x58a   :  { %3294 = vmatprep.subr.bf16.mxu1 %v3490_v0 }
 0x64f   :  { %v756_v62 = vpop.f32.mrb[4].mxu1 }
 0x650   :  { %v2994_v63 = vpop.f32.mrb[5].mxu1 }
 0x653   :  { %v831_v1 = vpop.f32.mrb[14].mxu0 }
 0x654   :  { %v832_v5 = vadd.f32 %v831_v1, %v756_v62  ;;  %v3005_v6 = vpop.f32.mrb[15].mxu0 }
 0x656   :  { %v835_v7 = vadd.f32 %v3756_v16, %v832_v5 }
 0x657   :  { %v936_v9 = vpop.f32.mrb[6].mxu1 }
 0x658   :  { %v937_v10 = vadd.f32 %v3666_v29, %v936_v9  ;;  %v3016_v11 = vpop.f32.mrb[7].mxu1  ;;  %843 = vrot.lane.b32.xlu0 %v835_v7, %s3495_s25  ;;  %v2725_v17 = vmul.f32 -1.442695, %v835_v7 }
 0x65a   :  { %948 = vrot.lane.b32.xlu1 %v937_v10, %s3493_s1  ;;  %v940_v15 = vadd.f32 %v937_v10, %v869_v14  ;;  %3410 = vpow2.f32 %v2725_v17 }
 0x65c   :  { %v2727_v18 = vmul.f32 -1.442695, %v940_v15 }
 0x65e   :  { %3412 = vpow2.f32 %v2727_v18 }
 0x664   :  { %v3411_v19 = vpop.eup %3410 }
 0x665   :  { %v839_v21 = vadd.f32 1.0, %v3411_v19 }
 0x667   :  { %3414 = vrcp.f32 %v839_v21 }
 0x668   :  { %v3413_v20 = vpop.eup %3412 }
 0x669   :  { %v944_v22 = vadd.f32 1.0, %v3413_v20 }
 0x66b   :  { %3416 = vrcp.f32 %v944_v22 }
 0x671   :  { %v3415_v23 = vpop.eup %3414 }
 0x672   :  { %v853_v37 = vsub.f32 1.0, %v3415_v23  ;;  %v859_v39 = vmul.f32 %v3415_v23, %v3769_v53 }
 0x675   :  { %v3417_v27 = vpop.eup %3416 }
 0x676   :  { %v958_v41 = vsub.f32 1.0, %v3417_v27  ;;  %v964_v45 = vmul.f32 %v3417_v27, %v3774_v58 }
 0x6ca   :  { %v844_v24 = vpop.permute.xlu0 %843 }
 0x6cb   :  { %v846_v25 = vmul.f32 %v3415_v23, %v844_v24 }
 0x6cc   :  { %v949_v28 = vpop.permute.xlu1 %948 }
 0x6cd   :  { %v951_v30 = vmul.f32 %v3417_v27, %v949_v28  ;;  %848 = vrot.lane.b32.xlu0 %v846_v25, %s3493_s1 }
 0x6cf   :  { %953 = vrot.lane.b32.xlu1 %v951_v30, %s3493_s1 }
 0x73f   :  { %v849_v31 = vpop.permute.xlu0 %848 }
 0x740   :  { %v851_v32 = vadd.f32 %v849_v31, %v835_v7 }
 0x741   :  { %v954_v33 = vpop.permute.xlu1 %953 }
 0x742   :  { %3418 = vtanh.f32 %v851_v32  ;;  %v956_v34 = vadd.f32 %v954_v33, %v869_v14 }
 0x744   :  { %3420 = vtanh.f32 %v956_v34 }
 0x74c   :  { %v3419_v35 = vpop.eup %3418 }
 0x74d   :  { %855 = vrot.lane.b32.xlu0 %v3419_v35, %s3494_s8 }
 0x74e   :  { %v3421_v36 = vpop.eup %3420 }
 0x74f   :  { %960 = vrot.lane.b32.xlu1 %v3421_v36, %s3494_s8 }
 0x7bf   :  { %v856_v38 = vpop.permute.xlu0 %855 }
 0x7c0   :  { %v858_v40 = vmul.f32 %v856_v38, %v853_v37 }
 0x7c1   :  { %v961_v43 = vpop.permute.xlu1 %960 }
 0x7c2   :  { %v3810_v44 = vadd.f32 %v859_v39, %v858_v40  ;;  %v963_v46 = vmul.f32 %v961_v43, %v958_v41 }
 0x7c4   :  { %v3813_v47 = vadd.f32 %v964_v45, %v963_v46  ;;  %862 = vrot.lane.b32.xlu0 %v3810_v44, %s3494_s8 }
 0x7c6   :  { %1039 = vrot.lane.b32.xlu1 %v3813_v47, %s3494_s8 }
 0x836   :  { %v863_v48 = vpop.permute.xlu0 %862 }
 0x837   :  { %866 = vst.msk [vmem:[#allocation3 + $0x8] sm:$0xff] %vm205_vm2, %v863_v48  ;;  %3026 = vmatmul.mubr.msk.f32.vlgmr.msra.gmra.mrb[16].mxu0 %vm205_vm2, %v863_v48  ;;  %v1424_v48 = vld [vmem:[#allocation2 + $0x20] sm:$0xff] }
 0x838   :  { %v1040_v49 = vpop.permute.xlu1 %1039  ;;  %3290 = vmatpush3.bf16.msra.mxu0 %v3584_v8  ;;  %3047 = vmatprep.mubr.msk.f32.mxu0 %vm3491_vm1, %v3492_v4 }
 0x839   :  { %3037 = vmatmul.mubr.msk.f32.vlgmr.msra.gmra.mrb[8].mxu1 %vm205_vm2, %v1040_v49  ;;  %3291 = vmatprep.subr.bf16.mxu0 %v3490_v0 }
 0x83a   :  { %3296 = vmatpush3.bf16.msra.mxu1 %v3693_v57  ;;  %3058 = vmatprep.mubr.msk.f32.mxu1 %vm3491_vm1, %v3492_v4 }
 0x83b   :  { %3297 = vmatprep.subr.bf16.mxu1 %v3490_v0 }
 0x83c   :  { %3293 = vmatpush3.bf16.msra.mxu0 %v3597_v12 }
 0x83d   :  { %3300 = vmatprep.subr.bf16.mxu0 %v3490_v0 }
 0x83e   :  { %3299 = vmatpush3.bf16.msra.mxu1 %v3713_v2 }
 0x83f   :  { %3048 = vmatmul.mubr.msk.f32.vlgmr.msra.gmra.mrb[18].mxu0 %vm205_vm2, %v1040_v49  ;;  %3306 = vmatprep.subr.bf16.mxu1 %v3490_v0  ;;  %v1425_v49 = vadd.f32 %v1424_v48, %v3680_v42 }
 0x840   :  { %3302 = vmatpush3.bf16.msra.mxu0 %v3704_v61  ;;  %3069 = vmatprep.mubr.msk.f32.mxu0 %vm3491_vm1, %v3492_v4 }
 0x841   :  { %3303 = vmatprep.subr.bf16.mxu0 %v3490_v0 }
 0x844   :  { %3305 = vmatpush3.bf16.msra.mxu0 %v3718_v3 }
 0x845   :  { %3312 = vmatprep.subr.bf16.mxu0 %v3490_v0 }
 0x90a   :  { %v1034_v50 = vpop.f32.mrb[16].mxu0 }
 0x90b   :  { %v3027_v51 = vpop.f32.mrb[17].mxu0 }
 0x90c   :  { %v1109_v52 = vpop.f32.mrb[8].mxu1 }
 0x90d   :  { %v1110_v53 = vadd.f32 %v1109_v52, %v1034_v50  ;;  %v3038_v26 = vpop.f32.mrb[9].mxu1 }
 0x90f   :  { %v1113_v54 = vadd.f32 %v3756_v16, %v1110_v53 }
 0x911   :  { %1121 = vrot.lane.b32.xlu0 %v1113_v54, %s3495_s25  ;;  %v2730_v62 = vmul.f32 -1.442695, %v1113_v54 }
 0x912   :  { %v1214_v55 = vpop.f32.mrb[18].mxu0 }
 0x913   :  { %v1215_v56 = vadd.f32 %v3666_v29, %v1214_v55  ;;  %v3049_v58 = vpop.f32.mrb[19].mxu0  ;;  %3422 = vpow2.f32 %v2730_v62 }
 0x915   :  { %1226 = vrot.lane.b32.xlu1 %v1215_v56, %s3493_s1  ;;  %v1218_v63 = vadd.f32 %v1215_v56, %v1147_v60 }
 0x917   :  { %v2732_v1 = vmul.f32 -1.442695, %v1218_v63 }
 0x919   :  { %3424 = vpow2.f32 %v2732_v1 }
 0x91d   :  { %v3423_v5 = vpop.eup %3422 }
 0x91e   :  { %v1117_v6 = vadd.f32 1.0, %v3423_v5 }
 0x920   :  { %3426 = vrcp.f32 %v1117_v6 }
 0x923   :  { %v3425_v7 = vpop.eup %3424 }
 0x924   :  { %v1222_v9 = vadd.f32 1.0, %v3425_v7 }
 0x926   :  { %3428 = vrcp.f32 %v1222_v9 }
 0x92a   :  { %v3427_v10 = vpop.eup %3426 }
 0x92b   :  { %v1131_v24 = vsub.f32 1.0, %v3427_v10  ;;  %v1137_v27 = vmul.f32 %v3427_v10, %v3810_v44 }
 0x930   :  { %v3429_v14 = vpop.eup %3428 }
 0x931   :  { %v1236_v31 = vsub.f32 1.0, %v3429_v14  ;;  %v1242_v33 = vmul.f32 %v3429_v14, %v3813_v47 }
 0x983   :  { %v1122_v11 = vpop.permute.xlu0 %1121 }
 0x984   :  { %v1124_v13 = vmul.f32 %v3427_v10, %v1122_v11 }
 0x986   :  { %1126 = vrot.lane.b32.xlu0 %v1124_v13, %s3493_s1 }
 0x987   :  { %v1227_v15 = vpop.permute.xlu1 %1226 }
 0x988   :  { %v1229_v17 = vmul.f32 %v3429_v14, %v1227_v15 }
 0x98a   :  { %1231 = vrot.lane.b32.xlu1 %v1229_v17, %s3493_s1 }
 0x9f8   :  { %v1127_v18 = vpop.permute.xlu0 %1126 }
 0x9f9   :  { %v1129_v19 = vadd.f32 %v1127_v18, %v1113_v54 }
 0x9fb   :  { %3430 = vtanh.f32 %v1129_v19 }
 0x9fc   :  { %v1232_v20 = vpop.permute.xlu1 %1231 }
 0x9fd   :  { %v1234_v21 = vadd.f32 %v1232_v20, %v1147_v60 }
 0x9ff   :  { %3432 = vtanh.f32 %v1234_v21 }
 0xa05   :  { %v3431_v22 = vpop.eup %3430 }
 0xa06   :  { %1133 = vrot.lane.b32.xlu0 %v3431_v22, %s3494_s8 }
 0xa09   :  { %v3433_v23 = vpop.eup %3432 }
 0xa0a   :  { %1238 = vrot.lane.b32.xlu1 %v3433_v23, %s3494_s8 }
 0xa78   :  { %v1134_v25 = vpop.permute.xlu0 %1133 }
 0xa79   :  { %v1136_v28 = vmul.f32 %v1134_v25, %v1131_v24 }
 0xa7b   :  { %v3851_v30 = vadd.f32 %v1137_v27, %v1136_v28 }
 0xa7c   :  { %v1239_v32 = vpop.permute.xlu1 %1238 }
 0xa7d   :  { %v1241_v34 = vmul.f32 %v1239_v32, %v1236_v31  ;;  %1140 = vrot.lane.b32.xlu0 %v3851_v30, %s3494_s8 }
 0xa7f   :  { %v3856_v35 = vadd.f32 %v1242_v33, %v1241_v34 }
 0xa81   :  { %1317 = vrot.lane.b32.xlu1 %v3856_v35, %s3494_s8 }
 0xaef   :  { %v1141_v36 = vpop.permute.xlu0 %1140 }
 0xaf0   :  { %1144 = vst.msk [vmem:[#allocation3 + $0x10] sm:$0xff] %vm205_vm2, %v1141_v36  ;;  %3059 = vmatmul.mubr.msk.f32.vlgmr.msra.gmra.mrb[10].mxu1 %vm205_vm2, %v1141_v36  ;;  %v1702_v36 = vld [vmem:[#allocation2 + $0x28] sm:$0xff] }
 0xaf1   :  { %3308 = vmatpush3.bf16.msra.mxu1 %v3584_v8  ;;  %3080 = vmatprep.mubr.msk.f32.mxu1 %vm3491_vm1, %v3492_v4 }
 0xaf2   :  { %3309 = vmatprep.subr.bf16.mxu1 %v3490_v0 }
 0xaf3   :  { %v1318_v37 = vpop.permute.xlu1 %1317 }
 0xaf4   :  { %3070 = vmatmul.mubr.msk.f32.vlgmr.msra.gmra.mrb[20].mxu0 %vm205_vm2, %v1318_v37 }
 0xaf5   :  { %3311 = vmatpush3.bf16.msra.mxu1 %v3597_v12  ;;  %3314 = vmatpush3.bf16.msra.mxu0 %v3693_v57 }
 0xaf6   :  { %3318 = vmatprep.subr.bf16.mxu1 %v3490_v0  ;;  %3315 = vmatprep.subr.bf16.mxu0 %v3490_v0 }
 0xaf7   :  { %3091 = vmatprep.mubr.msk.f32.mxu0 %vm3491_vm1, %v3492_v4 }
 0xaf8   :  { %3081 = vmatmul.mubr.msk.f32.vlgmr.msra.gmra.mrb[12].mxu1 %vm205_vm2, %v1318_v37  ;;  %v1703_v37 = vadd.f32 %v1702_v36, %v3680_v42 }
 0xaf9   :  { %3320 = vmatpush3.bf16.msra.mxu1 %v3704_v61  ;;  %3317 = vmatpush3.bf16.msra.mxu0 %v3713_v2 }
 0xafa   :  { %3321 = vmatprep.subr.bf16.mxu1 %v3490_v0  ;;  %3324 = vmatprep.subr.bf16.mxu0 %v3490_v0 }
 0xafb   :  { %3102 = vmatprep.mubr.msk.f32.mxu1 %vm3491_vm1, %v3492_v4 }
 0xafd   :  { %3323 = vmatpush3.bf16.msra.mxu1 %v3718_v3 }
 0xafe   :  { %3330 = vmatprep.subr.bf16.mxu1 %v3490_v0 }
 0xbc3   :  { %v1312_v38 = vpop.f32.mrb[10].mxu1 }
 0xbc4   :  { %v3060_v39 = vpop.f32.mrb[11].mxu1 }
 0xbc7   :  { %v1387_v40 = vpop.f32.mrb[20].mxu0 }
 0xbc8   :  { %v1388_v41 = vadd.f32 %v1387_v40, %v1312_v38  ;;  %v3071_v43 = vpop.f32.mrb[21].mxu0 }
 0xbca   :  { %v1391_v44 = vadd.f32 %v3756_v16, %v1388_v41 }
 0xbcb   :  { %v1492_v45 = vpop.f32.mrb[12].mxu1 }
 0xbcc   :  { %v1493_v46 = vadd.f32 %v3666_v29, %v1492_v45  ;;  %v3082_v47 = vpop.f32.mrb[13].mxu1  ;;  %1399 = vrot.lane.b32.xlu0 %v1391_v44, %s3495_s25  ;;  %v2735_v51 = vmul.f32 -1.442695, %v1391_v44 }
 0xbce   :  { %1504 = vrot.lane.b32.xlu1 %v1493_v46, %s3493_s1  ;;  %v1496_v50 = vadd.f32 %v1493_v46, %v1425_v49  ;;  %3434 = vpow2.f32 %v2735_v51 }
 0xbd0   :  { %v2737_v52 = vmul.f32 -1.442695, %v1496_v50 }
 0xbd2   :  { %3436 = vpow2.f32 %v2737_v52 }
 0xbd8   :  { %v3435_v53 = vpop.eup %3434 }
 0xbd9   :  { %v1395_v54 = vadd.f32 1.0, %v3435_v53 }
 0xbdb   :  { %3438 = vrcp.f32 %v1395_v54 }
 0xbdc   :  { %v3437_v26 = vpop.eup %3436 }
 0xbdd   :  { %v1500_v55 = vadd.f32 1.0, %v3437_v26 }
 0xbdf   :  { %3440 = vrcp.f32 %v1500_v55 }
 0xbe5   :  { %v3439_v56 = vpop.eup %3438 }
 0xbe6   :  { %v1409_v11 = vsub.f32 1.0, %v3439_v56  ;;  %v1415_v14 = vmul.f32 %v3439_v56, %v3851_v30 }
 0xbe9   :  { %v3441_v60 = vpop.eup %3440 }
 0xbea   :  { %v1514_v17 = vsub.f32 1.0, %v3441_v60  ;;  %v1520_v20 = vmul.f32 %v3441_v60, %v3856_v35 }
 0xc3e   :  { %v1400_v58 = vpop.permute.xlu0 %1399 }
 0xc3f   :  { %v1402_v59 = vmul.f32 %v3439_v56, %v1400_v58 }
 0xc40   :  { %v1505_v62 = vpop.permute.xlu1 %1504 }
 0xc41   :  { %v1507_v63 = vmul.f32 %v3441_v60, %v1505_v62  ;;  %1404 = vrot.lane.b32.xlu0 %v1402_v59, %s3493_s1 }
 0xc43   :  { %1509 = vrot.lane.b32.xlu1 %v1507_v63, %s3493_s1 }
 0xcb3   :  { %v1405_v1 = vpop.permute.xlu0 %1404 }
 0xcb4   :  { %v1407_v5 = vadd.f32 %v1405_v1, %v1391_v44 }
 0xcb5   :  { %v1510_v6 = vpop.permute.xlu1 %1509 }
 0xcb6   :  { %3442 = vtanh.f32 %v1407_v5  ;;  %v1512_v7 = vadd.f32 %v1510_v6, %v1425_v49 }
 0xcb8   :  { %3444 = vtanh.f32 %v1512_v7 }
 0xcc0   :  { %v3443_v9 = vpop.eup %3442 }
 0xcc1   :  { %1411 = vrot.lane.b32.xlu0 %v3443_v9, %s3494_s8 }
 0xcc2   :  { %v3445_v10 = vpop.eup %3444 }
 0xcc3   :  { %1516 = vrot.lane.b32.xlu1 %v3445_v10, %s3494_s8 }
 0xd33   :  { %v1412_v13 = vpop.permute.xlu0 %1411 }
 0xd34   :  { %v1414_v15 = vmul.f32 %v1412_v13, %v1409_v11 }
 0xd35   :  { %v1517_v18 = vpop.permute.xlu1 %1516 }
 0xd36   :  { %v3892_v19 = vadd.f32 %v1415_v14, %v1414_v15  ;;  %v1519_v21 = vmul.f32 %v1517_v18, %v1514_v17 }
 0xd38   :  { %v3895_v22 = vadd.f32 %v1520_v20, %v1519_v21  ;;  %1418 = vrot.lane.b32.xlu0 %v3892_v19, %s3494_s8 }
 0xd3a   :  { %1595 = vrot.lane.b32.xlu1 %v3895_v22, %s3494_s8 }
 0xdaa   :  { %v1419_v23 = vpop.permute.xlu0 %1418 }
 0xdab   :  { %1422 = vst.msk [vmem:[#allocation3 + $0x18] sm:$0xff] %vm205_vm2, %v1419_v23  ;;  %3092 = vmatmul.mubr.msk.f32.vlgmr.msra.gmra.mrb[22].mxu0 %vm205_vm2, %v1419_v23  ;;  %v1980_v23 = vld [vmem:[#allocation2 + $0x30] sm:$0xff] }
 0xdac   :  { %v1596_v24 = vpop.permute.xlu1 %1595  ;;  %3326 = vmatpush3.bf16.msra.mxu0 %v3584_v8  ;;  %3113 = vmatprep.mubr.msk.f32.mxu0 %vm3491_vm1, %v3492_v4 }
 0xdad   :  { %3103 = vmatmul.mubr.msk.f32.vlgmr.msra.gmra.mrb[14].mxu1 %vm205_vm2, %v1596_v24  ;;  %3327 = vmatprep.subr.bf16.mxu0 %v3490_v0 }
 0xdae   :  { %3332 = vmatpush3.bf16.msra.mxu1 %v3693_v57  ;;  %3124 = vmatprep.mubr.msk.f32.mxu1 %vm3491_vm1, %v3492_v4 }
 0xdaf   :  { %3333 = vmatprep.subr.bf16.mxu1 %v3490_v0 }
 0xdb0   :  { %3329 = vmatpush3.bf16.msra.mxu0 %v3597_v12 }
 0xdb1   :  { %3336 = vmatprep.subr.bf16.mxu0 %v3490_v0 }
 0xdb2   :  { %3335 = vmatpush3.bf16.msra.mxu1 %v3713_v2 }
 0xdb3   :  { %3114 = vmatmul.mubr.msk.f32.vlgmr.msra.gmra.mrb[24].mxu0 %vm205_vm2, %v1596_v24  ;;  %3342 = vmatprep.subr.bf16.mxu1 %v3490_v0  ;;  %v1981_v24 = vadd.f32 %v1980_v23, %v3680_v42 }
 0xdb4   :  { %3338 = vmatpush3.bf16.msra.mxu0 %v3704_v61  ;;  %3135 = vmatprep.mubr.msk.f32.mxu0 %vm3491_vm1, %v3492_v4 }
 0xdb5   :  { %3339 = vmatprep.subr.bf16.mxu0 %v3490_v0 }
 0xdb8   :  { %3341 = vmatpush3.bf16.msra.mxu0 %v3718_v3 }
 0xdb9   :  { %3348 = vmatprep.subr.bf16.mxu0 %v3490_v0 }
 0xe7e   :  { %v1590_v25 = vpop.f32.mrb[22].mxu0 }
 0xe7f   :  { %v3093_v27 = vpop.f32.mrb[23].mxu0 }
 0xe80   :  { %v1665_v28 = vpop.f32.mrb[14].mxu1 }
 0xe81   :  { %v1666_v30 = vadd.f32 %v1665_v28, %v1590_v25  ;;  %v3104_v31 = vpop.f32.mrb[15].mxu1 }
 0xe83   :  { %v1669_v32 = vadd.f32 %v3756_v16, %v1666_v30 }
 0xe85   :  { %1677 = vrot.lane.b32.xlu0 %v1669_v32, %s3495_s25  ;;  %v2740_v38 = vmul.f32 -1.442695, %v1669_v32 }
 0xe86   :  { %v1770_v33 = vpop.f32.mrb[24].mxu0 }
 0xe87   :  { %v1771_v34 = vadd.f32 %v3666_v29, %v1770_v33  ;;  %v3115_v35 = vpop.f32.mrb[25].mxu0  ;;  %3446 = vpow2.f32 %v2740_v38 }
 0xe89   :  { %1782 = vrot.lane.b32.xlu1 %v1771_v34, %s3493_s1  ;;  %v1774_v39 = vadd.f32 %v1771_v34, %v1703_v37 }
 0xe8b   :  { %v2742_v40 = vmul.f32 -1.442695, %v1774_v39 }
 0xe8d   :  { %3448 = vpow2.f32 %v2742_v40 }
 0xe91   :  { %v3447_v41 = vpop.eup %3446 }
 0xe92   :  { %v1673_v43 = vadd.f32 1.0, %v3447_v41 }
 0xe94   :  { %3450 = vrcp.f32 %v1673_v43 }
 0xe97   :  { %v3449_v44 = vpop.eup %3448 }
 0xe98   :  { %v1778_v45 = vadd.f32 1.0, %v3449_v44 }
 0xe9a   :  { %3452 = vrcp.f32 %v1778_v45 }
 0xe9e   :  { %v3451_v46 = vpop.eup %3450 }
 0xe9f   :  { %v1687_v58 = vsub.f32 1.0, %v3451_v46  ;;  %v1693_v60 = vmul.f32 %v3451_v46, %v3892_v19 }
 0xea4   :  { %v3453_v49 = vpop.eup %3452 }
 0xea5   :  { %v1792_v1 = vsub.f32 1.0, %v3453_v49  ;;  %v1798_v6 = vmul.f32 %v3453_v49, %v3895_v22 }
 0xef7   :  { %v1678_v47 = vpop.permute.xlu0 %1677 }
 0xef8   :  { %v1680_v48 = vmul.f32 %v3451_v46, %v1678_v47 }
 0xefa   :  { %1682 = vrot.lane.b32.xlu0 %v1680_v48, %s3493_s1 }
 0xefb   :  { %v1783_v50 = vpop.permute.xlu1 %1782 }
 0xefc   :  { %v1785_v51 = vmul.f32 %v3453_v49, %v1783_v50 }
 0xefe   :  { %1787 = vrot.lane.b32.xlu1 %v1785_v51, %s3493_s1 }
 0xf6c   :  { %v1683_v52 = vpop.permute.xlu0 %1682 }
 0xf6d   :  { %v1685_v53 = vadd.f32 %v1683_v52, %v1669_v32 }
 0xf6f   :  { %3454 = vtanh.f32 %v1685_v53 }
 0xf70   :  { %v1788_v26 = vpop.permute.xlu1 %1787 }
 0xf71   :  { %v1790_v54 = vadd.f32 %v1788_v26, %v1703_v37 }
 0xf73   :  { %3456 = vtanh.f32 %v1790_v54 }
 0xf79   :  { %v3455_v55 = vpop.eup %3454 }
 0xf7a   :  { %1689 = vrot.lane.b32.xlu0 %v3455_v55, %s3494_s8 }
 0xf7d   :  { %v3457_v56 = vpop.eup %3456 }
 0xf7e   :  { %1794 = vrot.lane.b32.xlu1 %v3457_v56, %s3494_s8 }
 0xfec   :  { %v1690_v59 = vpop.permute.xlu0 %1689 }
 0xfed   :  { %v1692_v62 = vmul.f32 %v1690_v59, %v1687_v58 }
 0xfef   :  { %v3933_v63 = vadd.f32 %v1693_v60, %v1692_v62 }
 0xff0   :  { %v1795_v5 = vpop.permute.xlu1 %1794 }
 0xff1   :  { %v1797_v7 = vmul.f32 %v1795_v5, %v1792_v1  ;;  %1696 = vrot.lane.b32.xlu0 %v3933_v63, %s3494_s8 }
 0xff3   :  { %v3938_v9 = vadd.f32 %v1798_v6, %v1797_v7 }
 0xff5   :  { %1873 = vrot.lane.b32.xlu1 %v3938_v9, %s3494_s8 }
0x1063   :  { %v1697_v10 = vpop.permute.xlu0 %1696 }
0x1064   :  { %1700 = vst.msk [vmem:[#allocation3 + $0x20] sm:$0xff] %vm205_vm2, %v1697_v10  ;;  %3125 = vmatmul.mubr.msk.f32.vlgmr.msra.gmra.mrb[16].mxu1 %vm205_vm2, %v1697_v10 }
0x1065   :  { %3344 = vmatpush3.bf16.msra.mxu1 %v3584_v8  ;;  %3146 = vmatprep.mubr.msk.f32.mxu1 %vm3491_vm1, %v3492_v4 }
0x1066   :  { %3345 = vmatprep.subr.bf16.mxu1 %v3490_v0 }
0x1067   :  { %v1874_v11 = vpop.permute.xlu1 %1873 }
0x1068   :  { %3136 = vmatmul.mubr.msk.f32.vlgmr.msra.gmra.mrb[26].mxu0 %vm205_vm2, %v1874_v11 }
0x1069   :  { %3347 = vmatpush3.bf16.msra.mxu1 %v3597_v12  ;;  %3350 = vmatpush3.bf16.msra.mxu0 %v3693_v57 }
0x106a   :  { %3354 = vmatprep.subr.bf16.mxu1 %v3490_v0  ;;  %3351 = vmatprep.subr.bf16.mxu0 %v3490_v0 }
0x106b   :  { %3157 = vmatprep.mubr.msk.f32.mxu0 %vm3491_vm1, %v3492_v4 }
0x106c   :  { %3147 = vmatmul.mubr.msk.f32.vlgmr.msra.gmra.mrb[18].mxu1 %vm205_vm2, %v1874_v11 }
0x106d   :  { %3356 = vmatpush3.bf16.msra.mxu1 %v3704_v61  ;;  %3353 = vmatpush3.bf16.msra.mxu0 %v3713_v2 }
0x106e   :  { %3357 = vmatprep.subr.bf16.mxu1 %v3490_v0  ;;  %3360 = vmatprep.subr.bf16.mxu0 %v3490_v0 }
0x106f   :  { %3168 = vmatprep.mubr.msk.f32.mxu1 %vm3491_vm1, %v3492_v4 }
0x1071   :  { %3359 = vmatpush3.bf16.msra.mxu1 %v3718_v3 }
0x1072   :  { %3366 = vmatprep.subr.bf16.mxu1 %v3490_v0 }
0x1137   :  { %v1868_v13 = vpop.f32.mrb[16].mxu1 }
0x1138   :  { %v3126_v14 = vpop.f32.mrb[17].mxu1 }
0x113b   :  { %v1943_v15 = vpop.f32.mrb[26].mxu0 }
0x113c   :  { %v1944_v17 = vadd.f32 %v1943_v15, %v1868_v13  ;;  %v3137_v18 = vpop.f32.mrb[27].mxu0 }
0x113e   :  { %v1947_v19 = vadd.f32 %v3756_v16, %v1944_v17 }
0x113f   :  { %v2048_v20 = vpop.f32.mrb[18].mxu1 }
0x1140   :  { %v2049_v21 = vadd.f32 %v3666_v29, %v2048_v20  ;;  %v3148_v22 = vpop.f32.mrb[19].mxu1  ;;  %1955 = vrot.lane.b32.xlu0 %v1947_v19, %s3495_s25  ;;  %v2745_v27 = vmul.f32 -1.442695, %v1947_v19 }
0x1141   :  { %v2548_v22 = vld [vmem:[%s4098_s10 + $0x8] sm:$0xff] }
0x1142   :  { %2060 = vrot.lane.b32.xlu1 %v2049_v21, %s3493_s1  ;;  %v2052_v25 = vadd.f32 %v2049_v21, %v1981_v24  ;;  %3458 = vpow2.f32 %v2745_v27  ;;  %v2547_v21 = vld [vmem:[%s4098_s10] sm:$0xff] }
0x1143   :  { %v3378_v23 = vpack.c.bf16 %v2548_v22, %v2547_v21 }
0x1144   :  { %v2747_v28 = vmul.f32 -1.442695, %v2052_v25 }
0x1146   :  { %3460 = vpow2.f32 %v2747_v28 }
0x114c   :  { %v3459_v30 = vpop.eup %3458 }
0x114d   :  { %v1951_v32 = vadd.f32 1.0, %v3459_v30 }
0x114f   :  { %3462 = vrcp.f32 %v1951_v32 }
0x1150   :  { %v3461_v31 = vpop.eup %3460 }
0x1151   :  { %v2056_v33 = vadd.f32 1.0, %v3461_v31 }
0x1153   :  { %3464 = vrcp.f32 %v2056_v33 }
0x1159   :  { %v3463_v29 = vpop.eup %3462 }
0x115a   :  { %v1965_v46 = vsub.f32 1.0, %v3463_v29  ;;  %v1971_v48 = vmul.f32 %v3463_v29, %v3933_v63 }
0x115d   :  { %v3465_v36 = vpop.eup %3464 }
0x115e   :  { %v2070_v50 = vsub.f32 1.0, %v3465_v36  ;;  %v2076_v53 = vmul.f32 %v3465_v36, %v3938_v9 }
0x11b2   :  { %v1956_v34 = vpop.permute.xlu0 %1955 }
0x11b3   :  { %v1958_v35 = vmul.f32 %v3463_v29, %v1956_v34 }
0x11b4   :  { %v2061_v37 = vpop.permute.xlu1 %2060 }
0x11b5   :  { %v2063_v38 = vmul.f32 %v3465_v36, %v2061_v37  ;;  %1960 = vrot.lane.b32.xlu0 %v1958_v35, %s3493_s1  ;;  %v2549_v37 = vld [vmem:[%s4098_s10 + $0x10] sm:$0xff] }
0x11b7   :  { %2065 = vrot.lane.b32.xlu1 %v2063_v38, %s3493_s1  ;;  %v2550_v38 = vld [vmem:[%s4098_s10 + $0x18] sm:$0xff] }
0x1227   :  { %v1961_v39 = vpop.permute.xlu0 %1960 }
0x1228   :  { %v1963_v40 = vadd.f32 %v1961_v39, %v1947_v19  ;;  %v3382_v39 = vpack.c.bf16 %v2550_v38, %v2549_v37 }
0x1229   :  { %v2066_v41 = vpop.permute.xlu1 %2065 }
0x122a   :  { %3466 = vtanh.f32 %v1963_v40  ;;  %v2068_v43 = vadd.f32 %v2066_v41, %v1981_v24  ;;  %v2539_v41 = vld [vmem:[#allocation3] sm:$0xff] }
0x122c   :  { %3468 = vtanh.f32 %v2068_v43 }
0x1234   :  { %v3467_v44 = vpop.eup %3466 }
0x1235   :  { %1967 = vrot.lane.b32.xlu0 %v3467_v44, %s3494_s8  ;;  %v2540_v44 = vld [vmem:[#allocation3 + $0x8] sm:$0xff] }
0x1236   :  { %v3469_v45 = vpop.eup %3468 }
0x1237   :  { %2072 = vrot.lane.b32.xlu1 %v3469_v45, %s3494_s8  ;;  %v2541_v45 = vld [vmem:[#allocation3 + $0x10] sm:$0xff] }
0x12a7   :  { %v1968_v47 = vpop.permute.xlu0 %1967 }
0x12a8   :  { %v1970_v49 = vmul.f32 %v1968_v47, %v1965_v46  ;;  %v2542_v46 = vld [vmem:[#allocation3 + $0x18] sm:$0xff]  ;;  %v2543_v47 = vld [vmem:[#allocation3 + $0x20] sm:$0xff] }
0x12a9   :  { %v2073_v51 = vpop.permute.xlu1 %2072 }
0x12aa   :  { %v3974_v52 = vadd.f32 %v1971_v48, %v1970_v49  ;;  %v2075_v26 = vmul.f32 %v2073_v51, %v2070_v50 }
0x12ac   :  { %v3977_v54 = vadd.f32 %v2076_v53, %v2075_v26  ;;  %1974 = vrot.lane.b32.xlu0 %v3974_v52, %s3494_s8 }
0x12ae   :  { %2151 = vrot.lane.b32.xlu1 %v3977_v54, %s3494_s8 }
0x131e   :  { %v1975_v55 = vpop.permute.xlu0 %1974 }
0x131f   :  { %1978 = vst.msk [vmem:[#allocation3 + $0x28] sm:$0xff] %vm205_vm2, %v1975_v55  ;;  %3158 = vmatmul.mubr.msk.f32.vlgmr.msra.gmra.mrb[28].mxu0 %vm205_vm2, %v1975_v55  ;;  %v3489_v55 = vld [vmem:[%s4097_s9] ss:$0 sm:$0xff] }
0x1320   :  { %3362 = vmatpush3.bf16.msra.mxu0 %v3584_v8  ;;  %v2152_v56 = vpop.permute.xlu1 %2151  ;;  %3179 = vmatprep.mubr.msk.f32.mxu0 %vm3491_vm1, %v3492_v4 }
0x1321   :  { %3169 = vmatmul.mubr.msk.f32.vlgmr.msra.gmra.mrb[20].mxu1 %vm205_vm2, %v2152_v56  ;;  %3363 = vmatprep.subr.bf16.mxu0 %v3490_v0 }
0x1322   :  { %3368 = vmatpush3.bf16.msra.mxu1 %v3693_v57  ;;  %3190 = vmatprep.mubr.msk.f32.mxu1 %vm3491_vm1, %v3492_v4 }
0x1323   :  { %3369 = vmatprep.subr.bf16.mxu1 %v3490_v0 }
0x1324   :  { %3365 = vmatpush3.bf16.msra.mxu0 %v3597_v12 }
0x1325   :  { %3372 = vmatprep.subr.bf16.mxu0 %v3490_v0 }
0x1326   :  { %3371 = vmatpush3.bf16.msra.mxu1 %v3713_v2  ;;  %v2544_v48 = vld [vmem:[#allocation3 + $0x28] sm:$0xff] }
0x1327   :  { %3180 = vmatmul.mubr.msk.f32.vlgmr.msra.gmra.mrb[30].mxu0 %vm205_vm2, %v2152_v56  ;;  %3379 = vmatprep.subr.bf16.mxu1 %v3378_v23 }
0x1328   :  { %3374 = vmatpush3.bf16.msra.mxu0 %v3704_v61  ;;  %3201 = vmatprep.mubr.msk.f32.mxu0 %vm3491_vm1, %v3492_v4  ;;  %v3488_v61 = vld [vmem:[%s4093_s6] ss:$0 sm:$0xff] }
0x1329   :  { %3375 = vmatprep.subr.bf16.mxu0 %v3490_v0  ;;  %v2258_v0 = vld [vmem:[#allocation2 + $0x38] sm:$0xff] }
0x132c   :  { %3377 = vmatpush3.bf16.msra.mxu0 %v3718_v3  ;;  %v2259_v3 = vadd.f32 %v2258_v0, %v3680_v42 }
0x13f2   :  { %v2146_v8 = vpop.f32.mrb[28].mxu0 }
0x13f3   :  { %v3159_v57 = vpop.f32.mrb[29].mxu0 }
0x13f4   :  { %v2221_v58 = vpop.f32.mrb[20].mxu1 }
0x13f5   :  { %v2222_v59 = vadd.f32 %v2221_v58, %v2146_v8  ;;  %v3170_v12 = vpop.f32.mrb[21].mxu1 }
0x13f7   :  { %v2225_v60 = vadd.f32 %v3756_v16, %v2222_v59 }
0x13f9   :  { %2233 = vrot.lane.b32.xlu0 %v2225_v60, %s3495_s25  ;;  %v2750_v63 = vmul.f32 -1.442695, %v2225_v60 }
0x13fa   :  { %v2326_v2 = vpop.f32.mrb[30].mxu0 }
0x13fb   :  { %v2327_v62 = vadd.f32 %v3488_v61, %v2326_v2  ;;  %v3181_v4 = vpop.f32.mrb[31].mxu0  ;;  %3470 = vpow2.f32 %v2750_v63 }
0x13fd   :  { %2338 = vrot.lane.b32.xlu1 %v2327_v62, %s3493_s1  ;;  %v2330_v1 = vadd.f32 %v2327_v62, %v2259_v3 }
0x13ff   :  { %v2752_v5 = vmul.f32 -1.442695, %v2330_v1 }
0x1401   :  { %3472 = vpow2.f32 %v2752_v5 }
0x1405   :  { %v3471_v16 = vpop.eup %3470 }
0x1406   :  { %v2229_v6 = vadd.f32 1.0, %v3471_v16 }
0x1408   :  { %3474 = vrcp.f32 %v2229_v6 }
0x140b   :  { %v3473_v7 = vpop.eup %3472 }
0x140c   :  { %v2334_v9 = vadd.f32 1.0, %v3473_v7 }
0x140e   :  { %3476 = vrcp.f32 %v2334_v9 }
0x1412   :  { %v3475_v10 = vpop.eup %3474 }
0x1413   :  { %v2243_v27 = vsub.f32 1.0, %v3475_v10  ;;  %v2249_v30 = vmul.f32 %v3475_v10, %v3974_v52 }
0x1418   :  { %v3477_v14 = vpop.eup %3476 }
0x1419   :  { %v2348_v33 = vsub.f32 1.0, %v3477_v14  ;;  %v2354_v34 = vmul.f32 %v3477_v14, %v3977_v54  ;;  %v2757_v54 = vld [vmem:[%s4100_s11] ss:$0 sm:$0xff] }
0x146b   :  { %v2234_v11 = vpop.permute.xlu0 %2233 }
0x146c   :  { %v2236_v13 = vmul.f32 %v3475_v10, %v2234_v11 }
0x146e   :  { %2238 = vrot.lane.b32.xlu0 %v2236_v13, %s3493_s1 }
0x146f   :  { %v2339_v15 = vpop.permute.xlu1 %2338 }
0x1470   :  { %v2341_v17 = vmul.f32 %v3477_v14, %v2339_v15 }
0x1472   :  { %2343 = vrot.lane.b32.xlu1 %v2341_v17, %s3493_s1 }
0x14e0   :  { %v2239_v42 = vpop.permute.xlu0 %2238 }
0x14e1   :  { %v2241_v18 = vadd.f32 %v2239_v42, %v2225_v60 }
0x14e3   :  { %3478 = vtanh.f32 %v2241_v18 }
0x14e4   :  { %v2344_v19 = vpop.permute.xlu1 %2343 }
0x14e5   :  { %v2346_v20 = vadd.f32 %v2344_v19, %v2259_v3 }
0x14e7   :  { %3480 = vtanh.f32 %v2346_v20 }
0x14ed   :  { %v3479_v24 = vpop.eup %3478 }
0x14ee   :  { %2245 = vrot.lane.b32.xlu0 %v3479_v24, %s3494_s8 }
0x14f1   :  { %v3481_v25 = vpop.eup %3480 }
0x14f2   :  { %2350 = vrot.lane.b32.xlu1 %v3481_v25, %s3494_s8 }
0x1560   :  { %v2246_v28 = vpop.permute.xlu0 %2245 }
0x1561   :  { %v2248_v31 = vmul.f32 %v2246_v28, %v2243_v27 }
0x1563   :  { %v4021_v32 = vadd.f32 %v2249_v30, %v2248_v31 }
0x1564   :  { %v2351_v29 = vpop.permute.xlu1 %2350 }
0x1565   :  { %v2353_v35 = vmul.f32 %v2351_v29, %v2348_v33  ;;  %2252 = vrot.lane.b32.xlu0 %v4021_v32, %s3494_s8 }
0x1567   :  { %v2355_v36 = vadd.f32 %v2354_v34, %v2353_v35 }
0x1569   :  { %2429 = vrot.lane.b32.xlu1 %v2355_v36, %s3494_s8 }
0x15d7   :  { %v2253_v40 = vpop.permute.xlu0 %2252 }
0x15d8   :  { %2256 = vst.msk [vmem:[#allocation3 + $0x30] sm:$0xff] %vm205_vm2, %v2253_v40  ;;  %3191 = vmatmul.mubr.msk.f32.vlgmr.msra.gmra.mrb[22].mxu1 %vm205_vm2, %v2253_v40 }
0x15d9   :  { %3381 = vmatpush3.bf16.msra.mxu1 %v3378_v23  ;;  %3212 = vmatprep.mubr.msk.f32.mxu1 %vm205_vm2, %v2539_v41 }
0x15da   :  { %3383 = vmatprep.subr.bf16.mxu1 %v3382_v39 }
0x15db   :  { %v2430_v43 = vpop.permute.xlu1 %2429 }
0x15dc   :  { %2536 = vst.msk [vmem:[%s4099_s13] sm:$0xff] %vm205_vm2, %v2430_v43  ;;  %3202 = vmatmul.mubr.msk.f32.vlgmr.msra.gmra.mrb[32].mxu0 %vm205_vm2, %v2430_v43 }
0x15dd   :  { %3385 = vmatpush3.bf16.msra.mxu1 %v3382_v39 }
0x15df   :  { %v2545_v49 = vld [vmem:[#allocation3 + $0x30] sm:$0xff] }
0x15e0   :  { %3213 = vmatmul.mubr.msk.f32.vlgmr.msra.gmra.mrb[24].mxu1 %vm205_vm2, %v2540_v44 }
0x15e1   :  { %3215 = vmatprep.mubr.msk.f32.mxu1 %vm205_vm2, %v2541_v45 }
0x15e4   :  { %3216 = vmatmul.mubr.msk.f32.gmra.mrb[26].mxu1 %vm205_vm2, %v2542_v46 }
0x15e5   :  { %3218 = vmatprep.mubr.msk.f32.mxu1 %vm205_vm2, %v2543_v47 }
0x15e8   :  { %3219 = vmatmul.mubr.msk.f32.gmra.mrb[28].mxu1 %vm205_vm2, %v2544_v48 }
0x15e9   :  { %3221 = vmatprep.mubr.msk.f32.mxu1 %vm205_vm2, %v2545_v49 }
0x16ab   :  { %v2424_v50 = vpop.f32.mrb[22].mxu1 }
0x16ac   :  { %v3192_v51 = vpop.f32.mrb[23].mxu1 }
0x16af   :  { %v2499_v52 = vpop.f32.mrb[32].mxu0 }
0x16b0   :  { %v2500_v53 = vadd.f32 %v2499_v52, %v2424_v50  ;;  %v3203_v26 = vpop.f32.mrb[33].mxu0 }
0x16b2   :  { %v2503_v56 = vadd.f32 %v3489_v55, %v2500_v53 }
0x16b3   :  { %v3214_v8 = vpop.f32.mrb[24].mxu1 }
0x16b4   :  { %v2654_v57 = vadd.f32 %v3214_v8, %v2757_v54  ;;  %v2648_v58 = vpop.f32.mrb[25].mxu1  ;;  %2511 = vrot.lane.b32.xlu0 %v2503_v56, %s3495_s25  ;;  %v2755_v63 = vmul.f32 -1.442695, %v2503_v56 }
0x16b5   :  { %v2649_v59 = vadd.f32 %v2757_v54, %v2648_v58 }
0x16b6   :  { %2688 = vst [vmem:[%s4101_s12 + $0x8] sm:$0xff] %v2654_v57  ;;  %3482 = vpow2.f32 %v2755_v63 }
0x16b7   :  { %2687 = vst [vmem:[%s4101_s12] sm:$0xff] %v2649_v59  ;;  %v3217_v12 = vpop.f32.mrb[26].mxu1 }
0x16b8   :  { %v2664_v60 = vadd.f32 %v3217_v12, %v2757_v54  ;;  %v2658_v2 = vpop.f32.mrb[27].mxu1 }
0x16b9   :  { %v2659_v61 = vadd.f32 %v2757_v54, %v2658_v2 }
0x16ba   :  { %2690 = vst [vmem:[%s4101_s12 + $0x18] sm:$0xff] %v2664_v60 }
0x16bb   :  { %2689 = vst [vmem:[%s4101_s12 + $0x10] sm:$0xff] %v2659_v61  ;;  %v3220_v62 = vpop.f32.mrb[28].mxu1 }
0x16bc   :  { %v2674_v4 = vadd.f32 %v3220_v62, %v2757_v54  ;;  %v2668_v0 = vpop.f32.mrb[29].mxu1 }
0x16bd   :  { %v2669_v3 = vadd.f32 %v2757_v54, %v2668_v0 }
0x16be   :  { %2692 = vst [vmem:[%s4101_s12 + $0x28] sm:$0xff] %v2674_v4 }
0x16bf   :  { %2691 = vst [vmem:[%s4101_s12 + $0x20] sm:$0xff] %v2669_v3 }
0x16c0   :  { %v3483_v1 = vpop.eup %3482 }
0x16c1   :  { %v2507_v5 = vadd.f32 1.0, %v3483_v1 }
0x16c3   :  { %3484 = vrcp.f32 %v2507_v5 }
0x16cd   :  { %v3485_v16 = vpop.eup %3484 }
0x16ce   :  { %v2521_v13 = vsub.f32 1.0, %v3485_v16  ;;  %v2527_v15 = vmul.f32 %v3485_v16, %v4021_v32 }
0x1726   :  { %v2512_v6 = vpop.permute.xlu0 %2511 }
0x1727   :  { %v2514_v7 = vmul.f32 %v3485_v16, %v2512_v6 }
0x1729   :  { %2516 = vrot.lane.b32.xlu1 %v2514_v7, %s3493_s1 }
0x179b   :  { %v2517_v9 = vpop.permute.xlu1 %2516 }
0x179c   :  { %v2519_v10 = vadd.f32 %v2517_v9, %v2503_v56 }
0x179e   :  { %3486 = vtanh.f32 %v2519_v10 }
0x17a8   :  { %v3487_v11 = vpop.eup %3486 }
0x17a9   :  { %2523 = vrot.lane.b32.xlu0 %v3487_v11, %s3494_s8 }
0x181b   :  { %v2524_v14 = vpop.permute.xlu0 %2523 }
0x181c   :  { %v2526_v17 = vmul.f32 %v2524_v14, %v2521_v13 }
0x181e   :  { %v2528_v42 = vadd.f32 %v2527_v15, %v2526_v17 }
0x1820   :  { %2530 = vrot.lane.b32.xlu1 %v2528_v42, %s3494_s8 }
0x1892   :  { %v2531_v18 = vpop.permute.xlu1 %2530 }
0x1893   :  { %2534 = vst.msk [vmem:[#allocation3 + $0x38] sm:$0xff] %vm205_vm2, %v2531_v18  ;;  %2756 = vst.msk [vmem:[%s4099_s13 + $0x8] sm:$0xff] %vm205_vm2, %v2531_v18 }
0x189a   :  { %v2546_v19 = vld [vmem:[#allocation3 + $0x38] sm:$0xff] }
0x189b   :  { %3222 = vmatmul.mubr.msk.f32.gmra.mrb[30].mxu1 %vm205_vm2, %v2546_v19 }
0x196e   :  { %v3223_v20 = vpop.f32.mrb[30].mxu1 }
0x196f   :  { %v2684_v21 = vadd.f32 %v3223_v20, %v2757_v54  ;;  %v2678_v22 = vpop.f32.mrb[31].mxu1 }
0x1970   :  { %v2679_v23 = vadd.f32 %v2757_v54, %v2678_v22 }
0x1971   :  { %2694 = vst [vmem:[%s4101_s12 + $0x38] sm:$0xff] %v2684_v21 }
0x1972   :  { %2693 = vst [vmem:[%s4101_s12 + $0x30] sm:$0xff] %v2679_v23 }

</bundles_post_ra>
